<compile_context>
chip_gen: v7x
topology: tpu7x:2x2x1
jax: 0.10.0
libtpu: 0.0.40
codegen_flags: <defaults>
</compile_context>

<pallas_src>
import jax
import jax.numpy as jnp
import numpy as np
from jax.experimental import pallas as pl
from jax.experimental.pallas import tpu as pltpu


# ----------------------------- model sizes -----------------------------
HIDDEN_SIZE = 32       # small-shape stand-in for 256
OUTPUT_SIZE = 64       # vocab size
MAX_LENGTH = 8         # small-shape stand-in for 40
PADDED_VOCAB = 128     # logits padded to a full 128-lane tile


# ------------------------------- kernel --------------------------------
def attn_decoder_kernel(
    tok_ref,       # SMEM (T,) int32   scalar-prefetch: token id per decode step
    emb_ref,       # VMEM (V, H)       embedding table (resident)
    h0_ref,        # VMEM (1, H)       initial hidden state
    enc_ref,       # VMEM (L, H)       encoder outputs (resident)
    w_attn_ref,    # VMEM (2, H, L)    attn weights   [embedded-half | hidden-half]
    b_attn_ref,    # VMEM (1, L)
    w_comb_ref,    # VMEM (2, H, H)    attn_combine   [embedded-half | applied-half]
    b_comb_ref,    # VMEM (1, H)
    w_ih_ref,      # VMEM (3, H, H)    GRU input weights, per gate [r, z, n]
    b_ih_ref,      # VMEM (3, 1, H)
    w_hh_ref,      # VMEM (3, H, H)    GRU hidden weights, per gate [r, z, n]
    b_hh_ref,      # VMEM (3, 1, H)
    w_out_ref,     # VMEM (H, VP)      output projection (V padded to VP lanes)
    b_out_ref,     # VMEM (1, VP)      padded lanes hold -1e30
    logp_ref,      # VMEM (1, VP) out  log_softmax(out(h_new)) for this step
    hnew_ref,      # VMEM (1, H)  out  new hidden state for this step
    attnw_ref,     # VMEM (1, L)  out  attention weights for this step
    h_scratch,     # VMEM (1, H)       hidden state carried across grid steps
):
    t = pl.program_id(0)

    @pl.when(t == 0)
    def _():
        h_scratch[...] = h0_ref[...]

    hidden = h_scratch[...]                                        # (1, H)

    # embedding lookup; token already clamped to [0, V) in the wrapper
    tok = tok_ref[t]
    embedded = emb_ref[pl.ds(tok, 1), :]                           # (1, H)
    # TODO(synk): dropout omitted (eval-mode identity; dropout_p only matters in training)

    # attn_weights = softmax(attn(cat(embedded, hidden)))  — concat removed by
    # splitting w_attn into its embedded-half and hidden-half.
    attn_logits = (
        jnp.dot(embedded, w_attn_ref[0], preferred_element_type=jnp.float32)
        + jnp.dot(hidden, w_attn_ref[1], preferred_element_type=jnp.float32)
        + b_attn_ref[...]
    )                                                              # (1, L)
    attn_logits = attn_logits - jnp.max(attn_logits, axis=1, keepdims=True)
    attn_exp = jnp.exp(attn_logits)
    attn_w = attn_exp * pl.reciprocal(
        jnp.sum(attn_exp, axis=1, keepdims=True), approx=True
    )
    attnw_ref[...] = attn_w

    # attn_applied = bmm(attn_weights, encoder_outputs)            # (1, H)
    attn_applied = jnp.dot(attn_w, enc_ref[...], preferred_element_type=jnp.float32)

    # output = relu(attn_combine(cat(embedded, attn_applied)))     # (1, H)
    comb = (
        jnp.dot(embedded, w_comb_ref[0], preferred_element_type=jnp.float32)
        + jnp.dot(attn_applied, w_comb_ref[1], preferred_element_type=jnp.float32)
        + b_comb_ref[...]
    )
    x = jnp.maximum(comb, 0.0)

    # GRU single step (PyTorch gate order r, z, n), per-gate lane-aligned weights
    i_r = jnp.dot(x, w_ih_ref[0], preferred_element_type=jnp.float32) + b_ih_ref[0]
    i_z = jnp.dot(x, w_ih_ref[1], preferred_element_type=jnp.float32) + b_ih_ref[1]
    i_n = jnp.dot(x, w_ih_ref[2], preferred_element_type=jnp.float32) + b_ih_ref[2]
    h_r = jnp.dot(hidden, w_hh_ref[0], preferred_element_type=jnp.float32) + b_hh_ref[0]
    h_z = jnp.dot(hidden, w_hh_ref[1], preferred_element_type=jnp.float32) + b_hh_ref[1]
    h_n = jnp.dot(hidden, w_hh_ref[2], preferred_element_type=jnp.float32) + b_hh_ref[2]
    r = jax.nn.sigmoid(i_r + h_r)
    z = jax.nn.sigmoid(i_z + h_z)
    n = jnp.tanh(i_n + r * h_n)
    h_new = (1.0 - z) * n + z * hidden
    hnew_ref[...] = h_new
    h_scratch[...] = h_new

    # output = log_softmax(out(h_new)) over VP lanes; padded lanes carry a
    # -1e30 bias so they contribute exp(...) == 0 and the first V lanes are exact.
    logits = (
        jnp.dot(h_new, w_out_ref[...], preferred_element_type=jnp.float32)
        + b_out_ref[...]
    )                                                              # (1, VP)
    m = jnp.max(logits, axis=1, keepdims=True)
    shifted = logits - m
    lse = jnp.log(jnp.sum(jnp.exp(shifted), axis=1, keepdims=True))
    logp_ref[...] = shifted - lse


# --------------------- one-time parameter preparation -------------------
def prepare_params(params):
    """Split / stack / lane-pad raw (pre-transposed) params for the kernel."""
    H, V, VP = HIDDEN_SIZE, OUTPUT_SIZE, PADDED_VOCAB

    split3 = lambda w: jnp.stack([w[:, 0:H], w[:, H:2 * H], w[:, 2 * H:3 * H]])
    w_out = jnp.zeros((H, VP), jnp.float32).at[:, :V].set(params["w_out"])
    b_out = jnp.full((1, VP), -1e30, jnp.float32).at[:, :V].set(params["b_out"])

    return {
        "embedding": params["embedding"].astype(jnp.float32),
        "w_attn": jnp.stack([params["w_attn"][:H], params["w_attn"][H:]]),   # (2,H,L)
        "b_attn": params["b_attn"].astype(jnp.float32),
        "w_comb": jnp.stack([params["w_comb"][:H], params["w_comb"][H:]]),   # (2,H,H)
        "b_comb": params["b_comb"].astype(jnp.float32),
        "w_ih": split3(params["w_ih"]),                                      # (3,H,H)
        "b_ih": params["b_ih"].reshape(3, 1, H),                             # (3,1,H)
        "w_hh": split3(params["w_hh"]),                                      # (3,H,H)
        "b_hh": params["b_hh"].reshape(3, 1, H),                             # (3,1,H)
        "w_out": w_out,                                                      # (H,VP)
        "b_out": b_out,                                                      # (1,VP)
    }


# ------------------------------ wrappers --------------------------------
def attn_decoder_decode(kparams, tokens, hidden0, encoder_outputs):
    """Run T (teacher-forced) decode steps inside a single pallas_call.

    tokens:           (T,) int32 token ids, one per decode step
    hidden0:          (1, 1, H) initial hidden state
    encoder_outputs:  (L, H)
    returns: (log_probs (T, V), hiddens (T, H), attn_weights (T, L)) per step.
    """
    H, V, L, VP = HIDDEN_SIZE, OUTPUT_SIZE, MAX_LENGTH, PADDED_VOCAB
    T = tokens.shape[0]

    tokens = jnp.clip(jnp.asarray(tokens, jnp.int32), 0, V - 1)  # bounds-safe gather
    h0 = hidden0.reshape(1, H).astype(jnp.float32)
    enc = encoder_outputs.astype(jnp.float32)

    def resident(shape):
        idx = (0,) * len(shape)
        return pl.BlockSpec(shape, lambda t, toks: idx)          # DMA'd once, resident

    def per_step(n):                                             # array (T, 1, n)
        return pl.BlockSpec((None, 1, n), lambda t, toks: (t, 0, 0))

    grid_spec = pltpu.PrefetchScalarGridSpec(
        num_scalar_prefetch=1,
        grid=(T,),
        in_specs=[
            resident((V, H)),                               # embedding table
            resident((1, H)),                               # initial hidden
            resident((L, H)),                               # encoder outputs
            resident((2, H, L)), resident((1, L)),          # attn
            resident((2, H, H)), resident((1, H)),          # attn_combine
            resident((3, H, H)), resident((3, 1, H)),       # GRU ih
            resident((3, H, H)), resident((3, 1, H)),       # GRU hh
            resident((H, VP)), resident((1, VP)),           # output projection
        ],
        out_specs=(per_step(VP), per_step(H), per_step(L)),
        scratch_shapes=[pltpu.VMEM((1, H), jnp.float32)],   # carried hidden state
    )

    out_shape = (
        jax.ShapeDtypeStruct((T, 1, VP), jnp.float32),      # lane-dense log-probs
        jax.ShapeDtypeStruct((T, 1, H), jnp.float32),       # hidden per step
        jax.ShapeDtypeStruct((T, 1, L), jnp.float32),       # attention weights per step
    )

    logp, hnew, attn_w = pl.pallas_call(
        attn_decoder_kernel,
        out_shape=out_shape,
        grid_spec=grid_spec,
        compiler_params=pltpu.CompilerParams(
            # decode steps are sequentially dependent through the hidden state
            dimension_semantics=("arbitrary",),
        ),
    )(
        tokens,
        kparams["embedding"], h0, enc,
        kparams["w_attn"], kparams["b_attn"],
        kparams["w_comb"], kparams["b_comb"],
        kparams["w_ih"], kparams["b_ih"],
        kparams["w_hh"], kparams["b_hh"],
        kparams["w_out"], kparams["b_out"],
    )
    return logp[:, 0, :V], hnew[:, 0, :], attn_w[:, 0, :]


def attn_decoder_forward(kparams, inseq, hidden, encoder_outputs):
    """Single decoding step, matching AttnDecoderRNN.forward semantics."""
    tokens = jnp.asarray(inseq, jnp.int32).reshape(1)
    logp, hnew, attn_w = attn_decoder_decode(kparams, tokens, hidden, encoder_outputs)
    return logp, hnew.reshape(1, 1, HIDDEN_SIZE), attn_w


# ----------------------- deterministic param init -----------------------
def init_params(key, hidden_size, output_size, max_length):
    H, V, L = hidden_size, output_size, max_length
    ks = jax.random.split(key, 12)
    u = lambda k, shape, scale: jax.random.uniform(k, shape, jnp.float32, -scale, scale)
    return {
        # nn.Embedding(output_size, hidden_size)
        "embedding": jax.random.normal(ks[0], (V, H), jnp.float32),
        # nn.Linear(2H, L)  -> stored transposed (in, out)
        "w_attn": u(ks[1], (2 * H, L), (2 * H) ** -0.5),
        "b_attn": u(ks[2], (1, L), (2 * H) ** -0.5),
        # nn.Linear(2H, H)
        "w_comb": u(ks[3], (2 * H, H), (2 * H) ** -0.5),
        "b_comb": u(ks[4], (1, H), (2 * H) ** -0.5),
        # nn.GRU(H, H): weight_ih (3H, H), weight_hh (3H, H) -> transposed
        "w_ih": u(ks[5], (H, 3 * H), H ** -0.5),
        "b_ih": u(ks[6], (1, 3 * H), H ** -0.5),
        "w_hh": u(ks[7], (H, 3 * H), H ** -0.5),
        "b_hh": u(ks[8], (1, 3 * H), H ** -0.5),
        # nn.Linear(H, V)
        "w_out": u(ks[9], (H, V), H ** -0.5),
        "b_out": u(ks[10], (1, V), H ** -0.5),
    }


# ------------------------- pure-JAX reference ----------------------------
def reference_decode(params, tokens, hidden0, encoder_outputs):
    H = HIDDEN_SIZE
    h = hidden0.reshape(1, H).astype(jnp.float32)
    enc = encoder_outputs.astype(jnp.float32)
    logps, hs, aws = [], [], []
    for t in range(tokens.shape[0]):
        emb = params["embedding"][tokens[t]][None, :]
        cat1 = jnp.concatenate([emb, h], axis=1)
        aw = jax.nn.softmax(cat1 @ params["w_attn"] + params["b_attn"], axis=1)
        applied = aw @ enc
        cat2 = jnp.concatenate([emb, applied], axis=1)
        x = jnp.maximum(cat2 @ params["w_comb"] + params["b_comb"], 0.0)
        gi = x @ params["w_ih"] + params["b_ih"]
        gh = h @ params["w_hh"] + params["b_hh"]
        i_r, i_z, i_n = gi[:, :H], gi[:, H:2 * H], gi[:, 2 * H:]
        h_r, h_z, h_n = gh[:, :H], gh[:, H:2 * H], gh[:, 2 * H:]
        r = jax.nn.sigmoid(i_r + h_r)
        z = jax.nn.sigmoid(i_z + h_z)
        n = jnp.tanh(i_n + r * h_n)
        h = (1.0 - z) * n + z * h
        logp = jax.nn.log_softmax(h @ params["w_out"] + params["b_out"], axis=1)
        logps.append(logp)
        hs.append(h)
        aws.append(aw)
    return jnp.concatenate(logps, 0), jnp.concatenate(hs, 0), jnp.concatenate(aws, 0)


# -------------------------------- main ----------------------------------
if __name__ == "__main__":
    key = jax.random.PRNGKey(0)
    pkey, hkey, ekey, tkey = jax.random.split(key, 4)

    params = init_params(pkey, HIDDEN_SIZE, OUTPUT_SIZE, MAX_LENGTH)
    kparams = prepare_params(params)

    T = 4
    tokens = jax.random.randint(tkey, (T,), 0, OUTPUT_SIZE, dtype=jnp.int32)
    hidden0 = jax.random.normal(hkey, (1, 1, HIDDEN_SIZE), jnp.float32)
    encoder_outputs = jax.random.normal(ekey, (MAX_LENGTH, HIDDEN_SIZE), jnp.float32)

    # multi-step decode: weights resident in VMEM, hidden carried in scratch
    log_probs, hiddens, attn_weights = attn_decoder_decode(
        kparams, tokens, hidden0, encoder_outputs)
    jax.block_until_ready((log_probs, hiddens, attn_weights))

    assert log_probs.shape == (T, OUTPUT_SIZE)
    assert hiddens.shape == (T, HIDDEN_SIZE)
    assert attn_weights.shape == (T, MAX_LENGTH)

    # single-step call matching the PyTorch module's forward signature
    lp1, h1, aw1 = attn_decoder_forward(kparams, tokens[0], hidden0, encoder_outputs)
    jax.block_until_ready((lp1, h1, aw1))
    assert lp1.shape == (1, OUTPUT_SIZE)
    assert h1.shape == (1, 1, HIDDEN_SIZE)
    assert aw1.shape == (1, MAX_LENGTH)

    # numerical sanity check against a plain-JAX transcription of the module
    ref_lp, ref_h, ref_aw = reference_decode(params, tokens, hidden0, encoder_outputs)
    np.testing.assert_allclose(np.asarray(log_probs), np.asarray(ref_lp), rtol=5e-2, atol=5e-2)
    np.testing.assert_allclose(np.asarray(hiddens), np.asarray(ref_h), rtol=5e-2, atol=5e-2)
    np.testing.assert_allclose(np.asarray(attn_weights), np.asarray(ref_aw), rtol=5e-2, atol=5e-2)

    print("KERNEL_OK")
</pallas_src>

<mosaic_0001>
module attributes {stable_mosaic.version = 11 : i64} {
  func.func @attn_decoder_kernel(%arg0: i32, %arg1: memref<4xi32, #tpu.memory_space<smem>>, %arg2: memref<64x32xf32, #tpu.memory_space<vmem>>, %arg3: memref<1x32xf32, #tpu.memory_space<vmem>>, %arg4: memref<8x32xf32, #tpu.memory_space<vmem>>, %arg5: memref<2x32x8xf32, #tpu.memory_space<vmem>>, %arg6: memref<1x8xf32, #tpu.memory_space<vmem>>, %arg7: memref<2x32x32xf32, #tpu.memory_space<vmem>>, %arg8: memref<1x32xf32, #tpu.memory_space<vmem>>, %arg9: memref<3x32x32xf32, #tpu.memory_space<vmem>>, %arg10: memref<3x1x32xf32, #tpu.memory_space<vmem>>, %arg11: memref<3x32x32xf32, #tpu.memory_space<vmem>>, %arg12: memref<3x1x32xf32, #tpu.memory_space<vmem>>, %arg13: memref<32x128xf32, #tpu.memory_space<vmem>>, %arg14: memref<1x128xf32, #tpu.memory_space<vmem>>, %arg15: memref<1x1x128xf32, #tpu.memory_space<vmem>>, %arg16: memref<1x1x32xf32, #tpu.memory_space<vmem>>, %arg17: memref<1x1x8xf32, #tpu.memory_space<vmem>>, %arg18: memref<1x32xf32, #tpu.memory_space<vmem>>) attributes {dimension_semantics = [#tpu.dimension_semantics<arbitrary>], iteration_bounds = array<i64: 4>, scalar_prefetch = 1 : i64, scratch_operands = 1 : i64, tpu.core_type = #tpu.core_type<tc>, window_params = [{pipeline_mode = #tpu.pipeline_mode<synchronous>, transform_indices = @transform_0, window_bounds = array<i64: 64, 32>}, {pipeline_mode = #tpu.pipeline_mode<synchronous>, transform_indices = @transform_1, window_bounds = array<i64: 1, 32>}, {pipeline_mode = #tpu.pipeline_mode<synchronous>, transform_indices = @transform_2, window_bounds = array<i64: 8, 32>}, {pipeline_mode = #tpu.pipeline_mode<synchronous>, transform_indices = @transform_3, window_bounds = array<i64: 2, 32, 8>}, {pipeline_mode = #tpu.pipeline_mode<synchronous>, transform_indices = @transform_4, window_bounds = array<i64: 1, 8>}, {pipeline_mode = #tpu.pipeline_mode<synchronous>, transform_indices = @transform_5, window_bounds = array<i64: 2, 32, 32>}, {pipeline_mode = #tpu.pipeline_mode<synchronous>, transform_indices = @transform_6, window_bounds = array<i64: 1, 32>}, {pipeline_mode = #tpu.pipeline_mode<synchronous>, transform_indices = @transform_7, window_bounds = array<i64: 3, 32, 32>}, {pipeline_mode = #tpu.pipeline_mode<synchronous>, transform_indices = @transform_8, window_bounds = array<i64: 3, 1, 32>}, {pipeline_mode = #tpu.pipeline_mode<synchronous>, transform_indices = @transform_9, window_bounds = array<i64: 3, 32, 32>}, {pipeline_mode = #tpu.pipeline_mode<synchronous>, transform_indices = @transform_10, window_bounds = array<i64: 3, 1, 32>}, {pipeline_mode = #tpu.pipeline_mode<synchronous>, transform_indices = @transform_11, window_bounds = array<i64: 32, 128>}, {pipeline_mode = #tpu.pipeline_mode<synchronous>, transform_indices = @transform_12, window_bounds = array<i64: 1, 128>}, {transform_indices = @transform_13, window_bounds = array<i64: 1, 1, 128>}, {transform_indices = @transform_14, window_bounds = array<i64: 1, 1, 32>}, {transform_indices = @transform_15, window_bounds = array<i64: 1, 1, 8>}]} {
    %c0_i32 = arith.constant 0 : i32
    %0 = arith.cmpi eq, %arg0, %c0_i32 : i32
    %1 = arith.extui %0 : i1 to i32
    %c0_i32_0 = arith.constant 0 : i32
    %2 = arith.cmpi ne, %1, %c0_i32_0 : i32
    scf.if %2 {
      %c0_89 = arith.constant 0 : index
      %c0_90 = arith.constant 0 : index
      %120 = vector.load %arg3[%c0_89, %c0_90] : memref<1x32xf32, #tpu.memory_space<vmem>>, vector<1x32xf32>
      %c0_91 = arith.constant 0 : index
      %c0_92 = arith.constant 0 : index
      %121 = vector.load %arg18[%c0_91, %c0_92] : memref<1x32xf32, #tpu.memory_space<vmem>>, vector<1x32xf32>
      tpu.vector_store %arg18[%c0_91, %c0_92], %120 {strides = array<i32>} : memref<1x32xf32, #tpu.memory_space<vmem>>, vector<1x32xf32>,
    } else {
    }
    %c0 = arith.constant 0 : index
    %c0_1 = arith.constant 0 : index
    %3 = vector.load %arg18[%c0, %c0_1] : memref<1x32xf32, #tpu.memory_space<vmem>>, vector<1x32xf32>
    %4 = arith.index_cast %arg0 : i32 to index
    %5 = memref.load %arg1[%4] : memref<4xi32, #tpu.memory_space<smem>>
    %6 = arith.index_cast %5 : i32 to index
    %c0_2 = arith.constant 0 : index
    %7 = vector.load %arg2[%6, %c0_2] : memref<64x32xf32, #tpu.memory_space<vmem>>, vector<1x32xf32>
    %c0_3 = arith.constant 0 : index
    %c0_4 = arith.constant 0 : index
    %c0_5 = arith.constant 0 : index
    %8 = vector.load %arg5[%c0_3, %c0_4, %c0_5] : memref<2x32x8xf32, #tpu.memory_space<vmem>>, vector<1x32x8xf32>
    %9 = vector.shape_cast %8 : vector<1x32x8xf32> to vector<32x8xf32>
    %cst = arith.constant dense<0.000000e+00> : vector<1x8xf32>
    %10 = tpu.matmul %7, %9, %cst {dimension_numbers = #tpu.dot_dimension_numbers<[1], [0], [0], [1], [0, 0, 1, 1], [], []>} : vector<1x32xf32>, vector<32x8xf32>, vector<1x8xf32> -> vector<1x8xf32>
    %c1 = arith.constant 1 : index
    %c0_6 = arith.constant 0 : index
    %c0_7 = arith.constant 0 : index
    %11 = vector.load %arg5[%c1, %c0_6, %c0_7] : memref<2x32x8xf32, #tpu.memory_space<vmem>>, vector<1x32x8xf32>
    %12 = vector.shape_cast %11 : vector<1x32x8xf32> to vector<32x8xf32>
    %cst_8 = arith.constant dense<0.000000e+00> : vector<1x8xf32>
    %13 = tpu.matmul %3, %12, %cst_8 {dimension_numbers = #tpu.dot_dimension_numbers<[1], [0], [0], [1], [0, 0, 1, 1], [], []>} : vector<1x32xf32>, vector<32x8xf32>, vector<1x8xf32> -> vector<1x8xf32>
    %14 = arith.addf %10, %13 : vector<1x8xf32>
    %c0_9 = arith.constant 0 : index
    %c0_10 = arith.constant 0 : index
    %15 = vector.load %arg6[%c0_9, %c0_10] : memref<1x8xf32, #tpu.memory_space<vmem>>, vector<1x8xf32>
    %16 = arith.addf %14, %15 : vector<1x8xf32>
    %cst_11 = arith.constant dense<0xFF800000> : vector<1xf32>
    %17 = vector.multi_reduction <maximumf>, %16, %cst_11 [1] : vector<1x8xf32> to vector<1xf32>
    %18 = vector.shape_cast %17 : vector<1xf32> to vector<1x1xf32>
    %19 = vector.broadcast %18 : vector<1x1xf32> to vector<1x8xf32>
    %20 = arith.subf %16, %19 : vector<1x8xf32>
    %21 = math.exp %20 : vector<1x8xf32>
    %cst_12 = arith.constant dense<0.000000e+00> : vector<1xf32>
    %22 = vector.multi_reduction <add>, %21, %cst_12 [1] : vector<1x8xf32> to vector<1xf32>
    %23 = vector.shape_cast %22 : vector<1xf32> to vector<1x1xf32>
    %24 = tpu.reciprocal %23 {approx = true} : vector<1x1xf32> -> vector<1x1xf32>
    %25 = vector.broadcast %24 : vector<1x1xf32> to vector<1x8xf32>
    %26 = arith.mulf %21, %25 : vector<1x8xf32>
    %c0_13 = arith.constant 0 : index
    %c0_14 = arith.constant 0 : index
    %c0_15 = arith.constant 0 : index
    %27 = vector.load %arg17[%c0_13, %c0_14, %c0_15] : memref<1x1x8xf32, #tpu.memory_space<vmem>>, vector<1x1x8xf32>
    %28 = vector.shape_cast %27 : vector<1x1x8xf32> to vector<1x8xf32>
    %29 = vector.shape_cast %26 : vector<1x8xf32> to vector<1x1x8xf32>
    tpu.vector_store %arg17[%c0_13, %c0_14, %c0_15], %29 {strides = array<i32>} : memref<1x1x8xf32, #tpu.memory_space<vmem>>, vector<1x1x8xf32>,
    %c0_16 = arith.constant 0 : index
    %c0_17 = arith.constant 0 : index
    %30 = vector.load %arg4[%c0_16, %c0_17] : memref<8x32xf32, #tpu.memory_space<vmem>>, vector<8x32xf32>
    %cst_18 = arith.constant dense<0.000000e+00> : vector<1x32xf32>
    %31 = tpu.matmul %26, %30, %cst_18 {dimension_numbers = #tpu.dot_dimension_numbers<[1], [0], [0], [1], [0, 0, 1, 1], [], []>} : vector<1x8xf32>, vector<8x32xf32>, vector<1x32xf32> -> vector<1x32xf32>
    %c0_19 = arith.constant 0 : index
    %c0_20 = arith.constant 0 : index
    %c0_21 = arith.constant 0 : index
    %32 = vector.load %arg7[%c0_19, %c0_20, %c0_21] : memref<2x32x32xf32, #tpu.memory_space<vmem>>, vector<1x32x32xf32>
    %33 = vector.shape_cast %32 : vector<1x32x32xf32> to vector<32x32xf32>
    %cst_22 = arith.constant dense<0.000000e+00> : vector<1x32xf32>
    %34 = tpu.matmul %7, %33, %cst_22 {dimension_numbers = #tpu.dot_dimension_numbers<[1], [0], [0], [1], [0, 0, 1, 1], [], []>} : vector<1x32xf32>, vector<32x32xf32>, vector<1x32xf32> -> vector<1x32xf32>
    %c1_23 = arith.constant 1 : index
    %c0_24 = arith.constant 0 : index
    %c0_25 = arith.constant 0 : index
    %35 = vector.load %arg7[%c1_23, %c0_24, %c0_25] : memref<2x32x32xf32, #tpu.memory_space<vmem>>, vector<1x32x32xf32>
    %36 = vector.shape_cast %35 : vector<1x32x32xf32> to vector<32x32xf32>
    %cst_26 = arith.constant dense<0.000000e+00> : vector<1x32xf32>
    %37 = tpu.matmul %31, %36, %cst_26 {dimension_numbers = #tpu.dot_dimension_numbers<[1], [0], [0], [1], [0, 0, 1, 1], [], []>} : vector<1x32xf32>, vector<32x32xf32>, vector<1x32xf32> -> vector<1x32xf32>
    %38 = arith.addf %34, %37 : vector<1x32xf32>
    %c0_27 = arith.constant 0 : index
    %c0_28 = arith.constant 0 : index
    %39 = vector.load %arg8[%c0_27, %c0_28] : memref<1x32xf32, #tpu.memory_space<vmem>>, vector<1x32xf32>
    %40 = arith.addf %38, %39 : vector<1x32xf32>
    %cst_29 = arith.constant 0.000000e+00 : f32
    %41 = vector.broadcast %cst_29 : f32 to vector<1x32xf32>
    %42 = arith.maximumf %40, %41 : vector<1x32xf32>
    %c0_30 = arith.constant 0 : index
    %c0_31 = arith.constant 0 : index
    %c0_32 = arith.constant 0 : index
    %43 = vector.load %arg9[%c0_30, %c0_31, %c0_32] : memref<3x32x32xf32, #tpu.memory_space<vmem>>, vector<1x32x32xf32>
    %44 = vector.shape_cast %43 : vector<1x32x32xf32> to vector<32x32xf32>
    %cst_33 = arith.constant dense<0.000000e+00> : vector<1x32xf32>
    %45 = tpu.matmul %42, %44, %cst_33 {dimension_numbers = #tpu.dot_dimension_numbers<[1], [0], [0], [1], [0, 0, 1, 1], [], []>} : vector<1x32xf32>, vector<32x32xf32>, vector<1x32xf32> -> vector<1x32xf32>
    %c0_34 = arith.constant 0 : index
    %c0_35 = arith.constant 0 : index
    %c0_36 = arith.constant 0 : index
    %46 = vector.load %arg10[%c0_34, %c0_35, %c0_36] : memref<3x1x32xf32, #tpu.memory_space<vmem>>, vector<1x1x32xf32>
    %47 = vector.shape_cast %46 : vector<1x1x32xf32> to vector<1x32xf32>
    %48 = arith.addf %45, %47 : vector<1x32xf32>
    %c1_37 = arith.constant 1 : index
    %c0_38 = arith.constant 0 : index
    %c0_39 = arith.constant 0 : index
    %49 = vector.load %arg9[%c1_37, %c0_38, %c0_39] : memref<3x32x32xf32, #tpu.memory_space<vmem>>, vector<1x32x32xf32>
    %50 = vector.shape_cast %49 : vector<1x32x32xf32> to vector<32x32xf32>
    %cst_40 = arith.constant dense<0.000000e+00> : vector<1x32xf32>
    %51 = tpu.matmul %42, %50, %cst_40 {dimension_numbers = #tpu.dot_dimension_numbers<[1], [0], [0], [1], [0, 0, 1, 1], [], []>} : vector<1x32xf32>, vector<32x32xf32>, vector<1x32xf32> -> vector<1x32xf32>
    %c1_41 = arith.constant 1 : index
    %c0_42 = arith.constant 0 : index
    %c0_43 = arith.constant 0 : index
    %52 = vector.load %arg10[%c1_41, %c0_42, %c0_43] : memref<3x1x32xf32, #tpu.memory_space<vmem>>, vector<1x1x32xf32>
    %53 = vector.shape_cast %52 : vector<1x1x32xf32> to vector<1x32xf32>
    %54 = arith.addf %51, %53 : vector<1x32xf32>
    %c2 = arith.constant 2 : index
    %c0_44 = arith.constant 0 : index
    %c0_45 = arith.constant 0 : index
    %55 = vector.load %arg9[%c2, %c0_44, %c0_45] : memref<3x32x32xf32, #tpu.memory_space<vmem>>, vector<1x32x32xf32>
    %56 = vector.shape_cast %55 : vector<1x32x32xf32> to vector<32x32xf32>
    %cst_46 = arith.constant dense<0.000000e+00> : vector<1x32xf32>
    %57 = tpu.matmul %42, %56, %cst_46 {dimension_numbers = #tpu.dot_dimension_numbers<[1], [0], [0], [1], [0, 0, 1, 1], [], []>} : vector<1x32xf32>, vector<32x32xf32>, vector<1x32xf32> -> vector<1x32xf32>
    %c2_47 = arith.constant 2 : index
    %c0_48 = arith.constant 0 : index
    %c0_49 = arith.constant 0 : index
    %58 = vector.load %arg10[%c2_47, %c0_48, %c0_49] : memref<3x1x32xf32, #tpu.memory_space<vmem>>, vector<1x1x32xf32>
    %59 = vector.shape_cast %58 : vector<1x1x32xf32> to vector<1x32xf32>
    %60 = arith.addf %57, %59 : vector<1x32xf32>
    %c0_50 = arith.constant 0 : index
    %c0_51 = arith.constant 0 : index
    %c0_52 = arith.constant 0 : index
    %61 = vector.load %arg11[%c0_50, %c0_51, %c0_52] : memref<3x32x32xf32, #tpu.memory_space<vmem>>, vector<1x32x32xf32>
    %62 = vector.shape_cast %61 : vector<1x32x32xf32> to vector<32x32xf32>
    %cst_53 = arith.constant dense<0.000000e+00> : vector<1x32xf32>
    %63 = tpu.matmul %3, %62, %cst_53 {dimension_numbers = #tpu.dot_dimension_numbers<[1], [0], [0], [1], [0, 0, 1, 1], [], []>} : vector<1x32xf32>, vector<32x32xf32>, vector<1x32xf32> -> vector<1x32xf32>
    %c0_54 = arith.constant 0 : index
    %c0_55 = arith.constant 0 : index
    %c0_56 = arith.constant 0 : index
    %64 = vector.load %arg12[%c0_54, %c0_55, %c0_56] : memref<3x1x32xf32, #tpu.memory_space<vmem>>, vector<1x1x32xf32>
    %65 = vector.shape_cast %64 : vector<1x1x32xf32> to vector<1x32xf32>
    %66 = arith.addf %63, %65 : vector<1x32xf32>
    %c1_57 = arith.constant 1 : index
    %c0_58 = arith.constant 0 : index
    %c0_59 = arith.constant 0 : index
    %67 = vector.load %arg11[%c1_57, %c0_58, %c0_59] : memref<3x32x32xf32, #tpu.memory_space<vmem>>, vector<1x32x32xf32>
    %68 = vector.shape_cast %67 : vector<1x32x32xf32> to vector<32x32xf32>
    %cst_60 = arith.constant dense<0.000000e+00> : vector<1x32xf32>
    %69 = tpu.matmul %3, %68, %cst_60 {dimension_numbers = #tpu.dot_dimension_numbers<[1], [0], [0], [1], [0, 0, 1, 1], [], []>} : vector<1x32xf32>, vector<32x32xf32>, vector<1x32xf32> -> vector<1x32xf32>
    %c1_61 = arith.constant 1 : index
    %c0_62 = arith.constant 0 : index
    %c0_63 = arith.constant 0 : index
    %70 = vector.load %arg12[%c1_61, %c0_62, %c0_63] : memref<3x1x32xf32, #tpu.memory_space<vmem>>, vector<1x1x32xf32>
    %71 = vector.shape_cast %70 : vector<1x1x32xf32> to vector<1x32xf32>
    %72 = arith.addf %69, %71 : vector<1x32xf32>
    %c2_64 = arith.constant 2 : index
    %c0_65 = arith.constant 0 : index
    %c0_66 = arith.constant 0 : index
    %73 = vector.load %arg11[%c2_64, %c0_65, %c0_66] : memref<3x32x32xf32, #tpu.memory_space<vmem>>, vector<1x32x32xf32>
    %74 = vector.shape_cast %73 : vector<1x32x32xf32> to vector<32x32xf32>
    %cst_67 = arith.constant dense<0.000000e+00> : vector<1x32xf32>
    %75 = tpu.matmul %3, %74, %cst_67 {dimension_numbers = #tpu.dot_dimension_numbers<[1], [0], [0], [1], [0, 0, 1, 1], [], []>} : vector<1x32xf32>, vector<32x32xf32>, vector<1x32xf32> -> vector<1x32xf32>
    %c2_68 = arith.constant 2 : index
    %c0_69 = arith.constant 0 : index
    %c0_70 = arith.constant 0 : index
    %76 = vector.load %arg12[%c2_68, %c0_69, %c0_70] : memref<3x1x32xf32, #tpu.memory_space<vmem>>, vector<1x1x32xf32>
    %77 = vector.shape_cast %76 : vector<1x1x32xf32> to vector<1x32xf32>
    %78 = arith.addf %75, %77 : vector<1x32xf32>
    %79 = arith.addf %48, %66 : vector<1x32xf32>
    %80 = arith.negf %79 : vector<1x32xf32>
    %81 = math.exp %80 : vector<1x32xf32>
    %cst_71 = arith.constant 1.000000e+00 : f32
    %82 = vector.broadcast %cst_71 : f32 to vector<1x32xf32>
    %83 = arith.addf %82, %81 : vector<1x32xf32>
    %84 = arith.divf %82, %83 : vector<1x32xf32>
    %85 = arith.addf %54, %72 : vector<1x32xf32>
    %86 = arith.negf %85 : vector<1x32xf32>
    %87 = math.exp %86 : vector<1x32xf32>
    %cst_72 = arith.constant 1.000000e+00 : f32
    %88 = vector.broadcast %cst_72 : f32 to vector<1x32xf32>
    %89 = arith.addf %88, %87 : vector<1x32xf32>
    %90 = arith.divf %88, %89 : vector<1x32xf32>
    %91 = arith.mulf %84, %78 : vector<1x32xf32>
    %92 = arith.addf %60, %91 : vector<1x32xf32>
    %93 = math.tanh %92 : vector<1x32xf32>
    %cst_73 = arith.constant 1.000000e+00 : f32
    %94 = vector.broadcast %cst_73 : f32 to vector<1x32xf32>
    %95 = arith.subf %94, %90 : vector<1x32xf32>
    %96 = arith.mulf %95, %93 : vector<1x32xf32>
    %97 = arith.mulf %90, %3 : vector<1x32xf32>
    %98 = arith.addf %96, %97 : vector<1x32xf32>
    %c0_74 = arith.constant 0 : index
    %c0_75 = arith.constant 0 : index
    %c0_76 = arith.constant 0 : index
    %99 = vector.load %arg16[%c0_74, %c0_75, %c0_76] : memref<1x1x32xf32, #tpu.memory_space<vmem>>, vector<1x1x32xf32>
    %100 = vector.shape_cast %99 : vector<1x1x32xf32> to vector<1x32xf32>
    %101 = vector.shape_cast %98 : vector<1x32xf32> to vector<1x1x32xf32>
    tpu.vector_store %arg16[%c0_74, %c0_75, %c0_76], %101 {strides = array<i32>} : memref<1x1x32xf32, #tpu.memory_space<vmem>>, vector<1x1x32xf32>,
    %c0_77 = arith.constant 0 : index
    %c0_78 = arith.constant 0 : index
    %102 = vector.load %arg18[%c0_77, %c0_78] : memref<1x32xf32, #tpu.memory_space<vmem>>, vector<1x32xf32>
    tpu.vector_store %arg18[%c0_77, %c0_78], %98 {strides = array<i32>} : memref<1x32xf32, #tpu.memory_space<vmem>>, vector<1x32xf32>,
    %c0_79 = arith.constant 0 : index
    %c0_80 = arith.constant 0 : index
    %103 = vector.load %arg13[%c0_79, %c0_80] : memref<32x128xf32, #tpu.memory_space<vmem>>, vector<32x128xf32>
    %cst_81 = arith.constant dense<0.000000e+00> : vector<1x128xf32>
    %104 = tpu.matmul %98, %103, %cst_81 {dimension_numbers = #tpu.dot_dimension_numbers<[1], [0], [0], [1], [0, 0, 1, 1], [], []>} : vector<1x32xf32>, vector<32x128xf32>, vector<1x128xf32> -> vector<1x128xf32>
    %c0_82 = arith.constant 0 : index
    %c0_83 = arith.constant 0 : index
    %105 = vector.load %arg14[%c0_82, %c0_83] : memref<1x128xf32, #tpu.memory_space<vmem>>, vector<1x128xf32>
    %106 = arith.addf %104, %105 : vector<1x128xf32>
    %cst_84 = arith.constant dense<0xFF800000> : vector<1xf32>
    %107 = vector.multi_reduction <maximumf>, %106, %cst_84 [1] : vector<1x128xf32> to vector<1xf32>
    %108 = vector.shape_cast %107 : vector<1xf32> to vector<1x1xf32>
    %109 = vector.broadcast %108 : vector<1x1xf32> to vector<1x128xf32>
    %110 = arith.subf %106, %109 : vector<1x128xf32>
    %111 = math.exp %110 : vector<1x128xf32>
    %cst_85 = arith.constant dense<0.000000e+00> : vector<1xf32>
    %112 = vector.multi_reduction <add>, %111, %cst_85 [1] : vector<1x128xf32> to vector<1xf32>
    %113 = vector.shape_cast %112 : vector<1xf32> to vector<1x1xf32>
    %114 = math.log %113 : vector<1x1xf32>
    %115 = vector.broadcast %114 : vector<1x1xf32> to vector<1x128xf32>
    %116 = arith.subf %110, %115 : vector<1x128xf32>
    %c0_86 = arith.constant 0 : index
    %c0_87 = arith.constant 0 : index
    %c0_88 = arith.constant 0 : index
    %117 = vector.load %arg15[%c0_86, %c0_87, %c0_88] : memref<1x1x128xf32, #tpu.memory_space<vmem>>, vector<1x1x128xf32>
    %118 = vector.shape_cast %117 : vector<1x1x128xf32> to vector<1x128xf32>
    %119 = vector.shape_cast %116 : vector<1x128xf32> to vector<1x1x128xf32>
    tpu.vector_store %arg15[%c0_86, %c0_87, %c0_88], %119 {strides = array<i32>} : memref<1x1x128xf32, #tpu.memory_space<vmem>>, vector<1x1x128xf32>,
    return
  }
  func.func @transform_0(%arg0: i32, %arg1: memref<4xi32, #tpu.memory_space<smem>>) -> (i32, i32) {
    %c0_i32 = arith.constant 0 : i32
    %c0_i32_0 = arith.constant 0 : i32
    %c0_i32_1 = arith.constant 0 : i32
    return %c0_i32, %c0_i32_0 : i32, i32
  }
  func.func @transform_1(%arg0: i32, %arg1: memref<4xi32, #tpu.memory_space<smem>>) -> (i32, i32) {
    %c0_i32 = arith.constant 0 : i32
    %c0_i32_0 = arith.constant 0 : i32
    %c0_i32_1 = arith.constant 0 : i32
    return %c0_i32, %c0_i32_0 : i32, i32
  }
  func.func @transform_2(%arg0: i32, %arg1: memref<4xi32, #tpu.memory_space<smem>>) -> (i32, i32) {
    %c0_i32 = arith.constant 0 : i32
    %c0_i32_0 = arith.constant 0 : i32
    %c0_i32_1 = arith.constant 0 : i32
    return %c0_i32, %c0_i32_0 : i32, i32
  }
  func.func @transform_3(%arg0: i32, %arg1: memref<4xi32, #tpu.memory_space<smem>>) -> (i32, i32, i32) {
    %c0_i32 = arith.constant 0 : i32
    %c0_i32_0 = arith.constant 0 : i32
    %c0_i32_1 = arith.constant 0 : i32
    %c0_i32_2 = arith.constant 0 : i32
    return %c0_i32, %c0_i32_0, %c0_i32_1 : i32, i32, i32
  }
  func.func @transform_4(%arg0: i32, %arg1: memref<4xi32, #tpu.memory_space<smem>>) -> (i32, i32) {
    %c0_i32 = arith.constant 0 : i32
    %c0_i32_0 = arith.constant 0 : i32
    %c0_i32_1 = arith.constant 0 : i32
    return %c0_i32, %c0_i32_0 : i32, i32
  }
  func.func @transform_5(%arg0: i32, %arg1: memref<4xi32, #tpu.memory_space<smem>>) -> (i32, i32, i32) {
    %c0_i32 = arith.constant 0 : i32
    %c0_i32_0 = arith.constant 0 : i32
    %c0_i32_1 = arith.constant 0 : i32
    %c0_i32_2 = arith.constant 0 : i32
    return %c0_i32, %c0_i32_0, %c0_i32_1 : i32, i32, i32
  }
  func.func @transform_6(%arg0: i32, %arg1: memref<4xi32, #tpu.memory_space<smem>>) -> (i32, i32) {
    %c0_i32 = arith.constant 0 : i32
    %c0_i32_0 = arith.constant 0 : i32
    %c0_i32_1 = arith.constant 0 : i32
    return %c0_i32, %c0_i32_0 : i32, i32
  }
  func.func @transform_7(%arg0: i32, %arg1: memref<4xi32, #tpu.memory_space<smem>>) -> (i32, i32, i32) {
    %c0_i32 = arith.constant 0 : i32
    %c0_i32_0 = arith.constant 0 : i32
    %c0_i32_1 = arith.constant 0 : i32
    %c0_i32_2 = arith.constant 0 : i32
    return %c0_i32, %c0_i32_0, %c0_i32_1 : i32, i32, i32
  }
  func.func @transform_8(%arg0: i32, %arg1: memref<4xi32, #tpu.memory_space<smem>>) -> (i32, i32, i32) {
    %c0_i32 = arith.constant 0 : i32
    %c0_i32_0 = arith.constant 0 : i32
    %c0_i32_1 = arith.constant 0 : i32
    %c0_i32_2 = arith.constant 0 : i32
    return %c0_i32, %c0_i32_0, %c0_i32_1 : i32, i32, i32
  }
  func.func @transform_9(%arg0: i32, %arg1: memref<4xi32, #tpu.memory_space<smem>>) -> (i32, i32, i32) {
    %c0_i32 = arith.constant 0 : i32
    %c0_i32_0 = arith.constant 0 : i32
    %c0_i32_1 = arith.constant 0 : i32
    %c0_i32_2 = arith.constant 0 : i32
    return %c0_i32, %c0_i32_0, %c0_i32_1 : i32, i32, i32
  }
  func.func @transform_10(%arg0: i32, %arg1: memref<4xi32, #tpu.memory_space<smem>>) -> (i32, i32, i32) {
    %c0_i32 = arith.constant 0 : i32
    %c0_i32_0 = arith.constant 0 : i32
    %c0_i32_1 = arith.constant 0 : i32
    %c0_i32_2 = arith.constant 0 : i32
    return %c0_i32, %c0_i32_0, %c0_i32_1 : i32, i32, i32
  }
  func.func @transform_11(%arg0: i32, %arg1: memref<4xi32, #tpu.memory_space<smem>>) -> (i32, i32) {
    %c0_i32 = arith.constant 0 : i32
    %c0_i32_0 = arith.constant 0 : i32
    %c0_i32_1 = arith.constant 0 : i32
    return %c0_i32, %c0_i32_0 : i32, i32
  }
  func.func @transform_12(%arg0: i32, %arg1: memref<4xi32, #tpu.memory_space<smem>>) -> (i32, i32) {
    %c0_i32 = arith.constant 0 : i32
    %c0_i32_0 = arith.constant 0 : i32
    %c0_i32_1 = arith.constant 0 : i32
    return %c0_i32, %c0_i32_0 : i32, i32
  }
  func.func @transform_13(%arg0: i32, %arg1: memref<4xi32, #tpu.memory_space<smem>>) -> (i32, i32, i32) {
    %c0_i32 = arith.constant 0 : i32
    %c0_i32_0 = arith.constant 0 : i32
    %c0_i32_1 = arith.constant 0 : i32
    return %arg0, %c0_i32, %c0_i32_0 : i32, i32, i32
  }
  func.func @transform_14(%arg0: i32, %arg1: memref<4xi32, #tpu.memory_space<smem>>) -> (i32, i32, i32) {
    %c0_i32 = arith.constant 0 : i32
    %c0_i32_0 = arith.constant 0 : i32
    %c0_i32_1 = arith.constant 0 : i32
    return %arg0, %c0_i32, %c0_i32_0 : i32, i32, i32
  }
  func.func @transform_15(%arg0: i32, %arg1: memref<4xi32, #tpu.memory_space<smem>>) -> (i32, i32, i32) {
    %c0_i32 = arith.constant 0 : i32
    %c0_i32_0 = arith.constant 0 : i32
    %c0_i32_1 = arith.constant 0 : i32
    return %arg0, %c0_i32, %c0_i32_0 : i32, i32, i32
  }
}

</mosaic_0001>

<bundles_post_ra>
// kernel: tpu_custom_call.1
= control target key start
LH: loop header
LB: loop body
LE: loop exit
PB: predicated region body
PF: predicated region fallthrough
CT: control target
= control target key end

     0   :  { %s3089_s0 = inlined_call_operand.hbm [shape: s32[4], index: 0, kind: input, shape index: {}]   ;;  %s3090_s1 = inlined_call_operand.vmem [shape: f32[64,32], index: 1, kind: input, shape index: {}]   ;;  %s3091_s2 = inlined_call_operand.hbm [shape: f32[1,32], index: 2, kind: input, shape index: {}]   ;;  %s3092_s3 = inlined_call_operand.hbm [shape: f32[8,32], index: 3, kind: input, shape index: {}]   ;;  %s3093_s4 = inlined_call_operand.vmem [shape: f32[2,32,8], index: 4, kind: input, shape index: {}]   ;;  %s3094_s5 = inlined_call_operand.hbm [shape: f32[1,8], index: 5, kind: input, shape index: {}]   ;;  %s3095_s6 = inlined_call_operand.hbm [shape: f32[2,32,32], index: 6, kind: input, shape index: {}]   ;;  %s3096_s7 = inlined_call_operand.vmem [shape: f32[1,32], index: 7, kind: input, shape index: {}]   ;;  %s3097_s8 = inlined_call_operand.vmem [shape: f32[3,32,32], index: 8, kind: input, shape index: {}]   ;;  %s3098_s9 = inlined_call_operand.vmem [shape: f32[3,1,32], index: 9, kind: input, shape index: {}]   ;;  %s3099_s10 = inlined_call_operand.vmem [shape: f32[3,32,32], index: 10, kind: input, shape index: {}]   ;;  %s3100_s11 = inlined_call_operand.vmem [shape: f32[3,1,32], index: 11, kind: input, shape index: {}]   ;;  %s3101_s12 = inlined_call_operand.hbm [shape: f32[32,128], index: 12, kind: input, shape index: {}]   ;;  %s3102_s13 = inlined_call_operand.vmem [shape: f32[1,128], index: 13, kind: input, shape index: {}]   ;;  %s3103_s14 = inlined_call_operand.hbm [shape: f32[4,1,128], index: 14, kind: output, shape index: {0}]   ;;  %s3104_s15 = inlined_call_operand.hbm [shape: f32[4,1,32], index: 15, kind: output, shape index: {1}]   ;;  %s3105_s16 = inlined_call_operand.hbm [shape: f32[4,1,8], index: 16, kind: output, shape index: {2}]  }
   0x1   :  { %3123 = sst [smem:[#allocation30_spill]] %s3089_s0 }
   0x2   :  { %3124 = sst [smem:[#allocation31_spill]] %s3092_s3  ;;  %s3128_s23 = sld [smem:[#allocation30_spill]] }
   0x3   :  { %3125 = sst [smem:[#allocation32_spill]] %s3098_s9 }
   0x4   :  { %3126 = sst [smem:[#allocation33_spill]] %s3103_s14 }
   0x5   :  { %3127 = sst [smem:[#allocation34_spill]] %s3105_s16 }
   0x8   :  { %s2181_s9 = scalar_lea.hbm %s3128_s23, 16 }
   0x9   :  { %p2182_p0 = scmp.ne.s32.totalorder %s3128_s23, %s2181_s9  ;;  %p2185_p1 = scmp.lt.u32.totalorder %s2181_s9, %s3128_s23 }
   0xb   :  { %p2187_p2 = pnand %p2185_p1, %p2182_p0 }
   0xd   :  { %2190 = shalt.err (!%p2187_p2)  }
   0xe   :  { %s2469_s28 = smov [#allocation4]  }
   0xf   :  { %23 = dma.hbm_to_smem %s3128_s23, 16, %s2469_s28, [#allocation3] }
  0x10   :  { %2431 = dma.done.wait [#allocation3], 16 }
  0x11   :  { %2432 = vsyncadd [#allocation3], 4294967280 }
  0x12   :  { %25 = sfence }
  0x13   :  { %26 = vsyncpa [#allocation6], 0 }
  0x14   :  { %27 = vsyncpa [#allocation9], 0 }
  0x15   :  { %28 = vsyncpa [#allocation12], 0 }
  0x16   :  { %29 = vsyncpa [#allocation7], 0 }
  0x17   :  { %31 = vsyncpa [#allocation7 + $0x1], 0 }
  0x18   :  { %32 = vsyncpa [#allocation16], 0 }
  0x19   :  { %34 = vsyncpa [#allocation16 + $0x1], 0  ;;  %s2580_s0 = smov 0   ;;  %s2582_s9 = smov 0  }
  0x1a   :  { %s2584_s17 = smov 0   ;;  %s2586_s18 = smov 0  }
  0x1b LB: > { %3129 = sst [smem:[#allocation24_spill]] %s2455_s0  ;;  %s2601_s19 = sadd.s32 4294967295, %s2467_s18   ;;  %s2467_s18 = sphi %s2586_s18, %s3160_s18   ;;  %s2463_s17 = sphi %s2584_s17, %s3162_s17   ;;  %s2459_s9 = sphi %s2582_s9, %s3164_s9   ;;  %s2455_s0 = sphi %s2580_s0, %s3163_s0  }
  0x1c   : > { %3130 = sst [smem:[#allocation25_spill]] %s2463_s17  ;;  %s3108_s20 = sadd.s32 4294967294, %s2467_s18  }
  0x1d   : > { %3131 = sst [smem:[#allocation26_spill]] %s2467_s18  ;;  %s2605_s21 = sadd.s32 1, %s2467_s18  }
  0x1e   : > { %3132 = sst [smem:[#allocation27_spill]] %s2605_s21  ;;  %s320_s22 = sadd.s32 1, %s2463_s17 }
  0x1f   : > { %s317_s23 = ssub.s32 %s2467_s18, %s2605_s21  ;;  %p330_p3 = scmp.ne.s32.totalorder %s2463_s17, %s2459_s9 }
  0x20   : > { %p318_p4 = scmp.eq.s32.totalorder %s317_s23, 0  ;;  %p331_p5 = scmp.eq.s32.totalorder %s2601_s19, 3 }
  0x21   : > { %p336_p6 = scmp.ne.s32.totalorder %s2459_s9, %s2455_s0  ;;  %p337_p7 = scmp.eq.s32.totalorder %s3108_s20, 3 }
  0x22   : > { %s2618_s24 = scalar_select %p318_p4, %s2463_s17, %s320_s22  }
  0x23   : > { %p2620_p8 = por %p331_p5, %p330_p3  ;;  %p2624_p9 = por %p337_p7, %p336_p6 }
  0x24   : > { %3133 = sst [smem:[#allocation28_spill]] %s2618_s24  ;;  %p1744_p10 = scmp.ge.s32.totalorder %s2467_s18, 1 }
  0x25   : > { %s3134_s25 = scalar_select %p2620_p8, 1, 0 }
  0x26   : > { %s3135_s26 = scalar_select %p2624_p9, 1, 0 }
  0x27   : > { %p396_p11 = scmp.lt.s32.totalorder %s2467_s18, 5  ;;  %p3116_p13 = scmp.eq.s32.totalorder %s2601_s19, 0 }
  0x28   : > { %3136 = sst [smem:[#allocation29_spill]] %s3135_s26  ;;  %s2470_s28 = smov [#allocation8]  }
  0x29   : > { %p2632_p0 = pnand %p1744_p10, %p396_p11  ;;  %s423_s29 = sshll.u32 %s2470_s28, 4  ;;  %s424_s29 = int_to_ptr.vmem [resolvable:$true] %s423_s29 }
  0x2a   : > { %s2471_s30 = smov [#allocation11]   ;;  %s2472_s20 = smov [#allocation5]  }
  0x2b   : > { %s3137_s27 = scalar_select %p2632_p0, 1, 0 }
  0x2c   : > { %p2083_p1 = pneg %p2632_p0  ;;  %s447_s22 = sshll.u32 %s2471_s30, 4  ;;  %s2644_s22 = int_to_ptr.vmem [resolvable:$true] %s447_s22 }
  0x2d   : > { %s2646_s24 = sshll.u32 %s2472_s20, 4  ;;  %s3139_s3 = sld [smem:[#allocation31_spill]]  ;;  %s413_s24 = int_to_ptr.vmem [resolvable:$true] %s2646_s24 }
  0x2e   : > { %p2640_p2 = pnand %p3116_p13, %p2083_p1 }
  0x30   : > { %p2656_p4 = pneg %p2640_p2 }
  0x33   : > { %s2191_s28 = scalar_lea.hbm %s3139_s3, 128 }
  0x34   : > { %p2192_p3 = scmp.ne.s32.totalorder %s3139_s3, %s2191_s28  ;;  %p2198_p7 = scmp.lt.u32.totalorder %s2191_s28, %s3139_s3 }
  0x36   : > { %p2194_p5 = pnand %p2656_p4, %p2192_p3 }
  0x38   : > { %p2195_p6 = pneg %p2194_p5 }
  0x3a   : > { %p2200_p10 = pnand %p2198_p7, %p2195_p6 }
  0x3c   : > { %2203 = shalt.err (!%p2200_p10)
}
  0x3d   : > { %s2204_s17 = scalar_lea.vmem %s424_s29, 128  ;;  %p2212_p13 = scmp.lt.s32.totalorder %s424_s29, %s424_s29 }
  0x3e   : > { %p2205_p11 = scmp.ne.s32.totalorder %s424_s29, %s2204_s17  ;;  %p2213_p9 = scmp.lt.s32.totalorder %s2204_s17, %s2204_s17 }
  0x40   : > { %p2207_p1 = pnand %p2205_p11, %p2656_p4  ;;  %p2214_p8 = por %p2213_p9, %p2212_p13 }
  0x42   : > { %p2208_p12 = pneg %p2207_p1 }
  0x44   : > { %p2215_p0 = pnand %p2214_p8, %p2208_p12 }
  0x46   : > { %2218 = shalt.err (!%p2215_p0)
}
  0x47   : > { %2089 = dma.hbm_to_vmem [thread:$0]  (!%p2640_p2), %s3139_s3, 128, %s424_s29, [#allocation9]  }
  0x48   : > { %s2219_s28 = scalar_lea.hbm %s3095_s6, 1024 }
  0x49   : > { %p2220_p3 = scmp.ne.s32.totalorder %s3095_s6, %s2219_s28  ;;  %p2226_p8 = scmp.lt.u32.totalorder %s2219_s28, %s3095_s6 }
  0x4b   : > { %p2222_p5 = pnand %p2220_p3, %p2656_p4 }
  0x4d   : > { %p2223_p9 = pneg %p2222_p5 }
  0x4f   : > { %p2228_p12 = pnand %p2226_p8, %p2223_p9 }
  0x51   : > { %2231 = shalt.err (!%p2228_p12)
}
  0x52   : > { %s2232_s29 = scalar_lea.vmem %s2644_s22, 1024  ;;  %p2240_p7 = scmp.lt.s32.totalorder %s2644_s22, %s2644_s22 }
  0x53   : > { %p2233_p13 = scmp.ne.s32.totalorder %s2644_s22, %s2232_s29  ;;  %p2241_p10 = scmp.lt.s32.totalorder %s2232_s29, %s2232_s29 }
  0x55   : > { %p2235_p0 = pnand %p2233_p13, %p2656_p4  ;;  %p2242_p11 = por %p2241_p10, %p2240_p7 }
  0x57   : > { %p2236_p6 = pneg %p2235_p0 }
  0x59   : > { %p2243_p1 = pnand %p2242_p11, %p2236_p6 }
  0x5b   : > { %2246 = shalt.err (!%p2243_p1)
}
  0x5c   : > { %s3121_s14 = smov 128   ;;  %s3122_s16 = smov 8  }
  0x5d   : > { %2095 = dma.hbm_to_vmem [thread:$0]  (!%p2640_p2), %s3095_s6, 1024, %s2644_s22, [#allocation12], %s3121_s14, %s3121_s14, %s3122_s16  }
  0x5e   : > { %s2247_s28 = scalar_lea.hbm %s3091_s2, 16 }
  0x5f   : > { %p2248_p3 = scmp.ne.s32.totalorder %s3091_s2, %s2247_s28  ;;  %p2254_p8 = scmp.lt.u32.totalorder %s2247_s28, %s3091_s2 }
  0x61   : > { %p2250_p5 = pnand %p2248_p3, %p2656_p4 }
  0x63   : > { %p2251_p9 = pneg %p2250_p5 }
  0x65   : > { %p2256_p12 = pnand %p2254_p8, %p2251_p9 }
  0x67   : > { %2259 = shalt.err (!%p2256_p12)
}
  0x68   : > { %s2260_s0 = scalar_lea.vmem %s413_s24, 16  ;;  %s2267_s22 = scalar_lea.vmem %s413_s24, 32 }
  0x69   : > { %p2261_p13 = scmp.ne.s32.totalorder %s413_s24, %s2260_s0  ;;  %p2268_p7 = scmp.lt.s32.totalorder %s413_s24, %s413_s24 }
  0x6a   : > { %p2269_p10 = scmp.lt.s32.totalorder %s2267_s22, %s2260_s0 }
  0x6b   : > { %p2263_p0 = pnand %p2261_p13, %p2656_p4 }
  0x6c   : > { %p2270_p11 = por %p2269_p10, %p2268_p7 }
  0x6d   : > { %p2264_p6 = pneg %p2263_p0 }
  0x6f   : > { %p2271_p1 = pnand %p2270_p11, %p2264_p6 }
  0x71   : > { %2274 = shalt.err (!%p2271_p1)
}
  0x72   : > { %2086 = dma.hbm_to_vmem [thread:$0]  (!%p2640_p2), %s3091_s2, 16, %s413_s24, [#allocation6]  }
  0x73   : > { %s2475_s3 = smov [#allocation10]   ;;  %s2476_s28 = smov [#allocation13]  }
  0x74   : > { %s437_s26 = sshll.u32 %s2475_s3, 4  ;;  %s475_s20 = sshll.u32 %s2476_s28, 4  ;;  %s438_s26 = int_to_ptr.vmem [resolvable:$true] %s437_s26  ;;  %s476_s20 = int_to_ptr.vmem [resolvable:$true] %s475_s20 }
  0x75   : > { %s2275_s14 = scalar_lea.hbm %s3094_s5, 16 }
  0x76   : > { %p2276_p3 = scmp.ne.s32.totalorder %s3094_s5, %s2275_s14  ;;  %p2282_p8 = scmp.lt.u32.totalorder %s2275_s14, %s3094_s5 }
  0x78   : > { %p2278_p5 = pnand %p2276_p3, %p2656_p4 }
  0x7a   : > { %p2279_p9 = pneg %p2278_p5 }
  0x7c   : > { %p2284_p12 = pnand %p2282_p8, %p2279_p9 }
  0x7e   : > { %2287 = shalt.err (!%p2284_p12)
}
  0x7f   : > { %s2288_s24 = scalar_lea.vmem %s438_s26, 16  ;;  %s2295_s18 = scalar_lea.vmem %s438_s26, 32 }
  0x80   : > { %p2289_p13 = scmp.ne.s32.totalorder %s438_s26, %s2288_s24  ;;  %p2296_p7 = scmp.lt.s32.totalorder %s438_s26, %s438_s26 }
  0x81   : > { %p2297_p10 = scmp.lt.s32.totalorder %s2295_s18, %s2288_s24 }
  0x82   : > { %p2291_p0 = pnand %p2289_p13, %p2656_p4 }
  0x83   : > { %p2298_p11 = por %p2297_p10, %p2296_p7 }
  0x84   : > { %p2292_p6 = pneg %p2291_p0 }
  0x86   : > { %p2299_p1 = pnand %p2298_p11, %p2292_p6 }
  0x88   : > { %2302 = shalt.err (!%p2299_p1)
}
  0x89   : > { %2092 = dma.hbm_to_vmem [thread:$0]  (!%p2640_p2), %s3094_s5, 16, %s438_s26, [#allocation9]  }
  0x8a   : > { %s2303_s17 = scalar_lea.hbm %s3101_s12, 512 }
  0x8b   : > { %p2304_p3 = scmp.ne.s32.totalorder %s3101_s12, %s2303_s17  ;;  %p2310_p8 = scmp.lt.u32.totalorder %s2303_s17, %s3101_s12 }
  0x8d   : > { %p2306_p5 = pnand %p2304_p3, %p2656_p4 }
  0x8f   : > { %p2307_p9 = pneg %p2306_p5 }
  0x91   : > { %p2312_p12 = pnand %p2310_p8, %p2307_p9 }
  0x93   : > { %2315 = shalt.err (!%p2312_p12)
}
  0x94   : > { %s2316_s24 = scalar_lea.vmem %s476_s20, 512  ;;  %p2324_p7 = scmp.lt.s32.totalorder %s476_s20, %s476_s20 }
  0x95   : > { %p2317_p13 = scmp.ne.s32.totalorder %s476_s20, %s2316_s24  ;;  %p2325_p10 = scmp.lt.s32.totalorder %s2316_s24, %s2316_s24 }
  0x97   : > { %p2319_p0 = pnand %p2317_p13, %p2656_p4  ;;  %p2326_p11 = por %p2325_p10, %p2324_p7 }
  0x99   : > { %p2320_p6 = pneg %p2319_p0 }
  0x9b   : > { %p2327_p1 = pnand %p2326_p11, %p2320_p6 }
  0x9d   : > { %2330 = shalt.err (!%p2327_p1)
}
  0x9e   : > { %s3141_s26 = smov 8   ;;  %s3142_s18 = smov 128  }
  0x9f   : > { %2098 = dma.hbm_to_vmem [thread:$0]  (!%p2640_p2), %s3101_s12, 512, %s476_s20, [#allocation12], %s3142_s18, %s3142_s18, %s3141_s26  }
  0xa0   : > { %p3143_p3 = scmp.ne.s32.totalorder %s3137_s27, 0 }
  0xa1   : > { %p3144_p4 = scmp.eq.s32.totalorder (!%p3143_p3), %s2601_s19, 0 }
  0xa2   : > { %494 = sbr.rel (%p3143_p3) target bundleno = 1975 (0x7b7), region = 72 }
  0xa9   : > { %2434 = dma.done.wait (%p3144_p4), [#allocation6], 16   ;;  %p3145_p5 = pmov %p3144_p4 }
  0xaa   : > { %p3146_p9 = pmov %p3144_p4 }
  0xab   : > { %2436 = vsyncadd (%p3145_p5), [#allocation6], 4294967280 }
  0xac   : > { %2438 = dma.done.wait (%p3146_p9), [#allocation9], 144   ;;  %p3147_p8 = pmov %p3144_p4 }
  0xad   : > { %p3148_p12 = pmov %p3144_p4 }
  0xae   : > { %2440 = vsyncadd (%p3147_p8), [#allocation9], 4294967152 }
  0xaf   : > { %2442 = dma.done.wait (%p3148_p12), [#allocation12], 1536   ;;  %p3149_p2 = pmov %p3144_p4 }
  0xb0   : > { %s2771_s27 = sand.u32 1, %s2459_s9   ;;  %p3150_p13 = scmp.ne.s32.totalorder %s2601_s19, 0 }
  0xb1   : > { %2444 = vsyncadd (%p3149_p2), [#allocation12], 4294965760  ;;  %s547_s23 = scalar_lea.vmem [#allocation14], %s2771_s27  ;;  %s553_s30 = scalar_lea.vmem [#allocation15], %s2771_s27  ;;  %v564_v0 = vld [vmem:[#allocation5] sm:$0x1] (!%p3150_p13) }
  0xb2   : > { %s559_s20 = scalar_lea.vmem [#allocation17], %s2771_s27  ;;  %563 = sbr.rel (%p3150_p13) target bundleno = 185 (0xb9), region = 96  ;;  %vm565_vm0 = vcmask (!%p3150_p13), 253952  }
  0xb3   : > { %566 = vst.msk [vmem:[#allocation2] sm:$0x1] (!%p3150_p13), %vm565_vm0, %v564_v0 }
  0xb9 PF: > { %v1757_v1 = vld [vmem:[%s3093_s4 + $0x20] sm:$0xff]  ;;  %v1758_v2 = vld [vmem:[%s3093_s4 + $0x28] sm:$0xff]  ;;  %v2477_v4 = vmov 0.0|0.0   ;;  %v1759_v7 = vld [vmem:[%s3093_s4 + $0x30] sm:$0xff]  ;;  %s568_s14 = sld [smem:[#allocation4 + %s2601_s19]]  ;;  %vm2478_vm1 = vmmov 0  }
  0xba   : > { %v571_v3 = vld [vmem:[%s3093_s4] sm:$0xff]  ;;  %1983 = vmatprep.subr.bf16.mxu0 %v2477_v4  ;;  %1989 = vmatprep.subr.bf16.mxu1 %v2477_v4  ;;  %v1984_v5 = vpack.c.bf16 %v1758_v2, %v1757_v1  ;;  %v572_v6 = vld [vmem:[%s3093_s4 + $0x8] sm:$0xff]  ;;  %v1760_v8 = vld [vmem:[%s3093_s4 + $0x38] sm:$0xff]  ;;  %v2479_v12 = vmov 0.0   ;;  %vm580_vm2 = vcmask 261120   ;;  %vm729_vm3 = vcmask 57344  }
  0xbb   : > { %v1990_v9 = vpack.c.bf16 %v572_v6, %v571_v3  ;;  %v573_v10 = vld [vmem:[%s3093_s4 + $0x10] sm:$0xff]  ;;  %v574_v11 = vld [vmem:[%s3093_s4 + $0x18] sm:$0xff]  ;;  %1865 = vmatprep.mubr.msk.f32.mxu0 %vm2478_vm1, %v2479_v12  ;;  %1876 = vmatprep.mubr.msk.f32.mxu1 %vm2478_vm1, %v2479_v12  ;;  %v1987_v13 = vpack.c.bf16 %v1760_v8, %v1759_v7  ;;  %v2811_v15 = vld [vmem:[#allocation2] sm:$0x1]  ;;  %vm743_vm4 = vcmask 64512   ;;  %vm1454_vm5 = vcmask 253952  }
  0xbc   : > { %1985 = vmatpush3.bf16.msra.mxu0 %v1984_v5  ;;  %v1993_v14 = vpack.c.bf16 %v574_v11, %v573_v10  ;;  %v727_v20 = vld [vmem:[#allocation10] sm:$0x1]  ;;  %v742_v30 = vld [vmem:[#allocation8] sm:$0xff]  ;;  %v822_v31 = vld [vmem:[#allocation11 + $0x20] sm:$0xff]  ;;  %vm1535_vm6 = vcmask 1040384   ;;  %s1553_s17 = sand.u32 1, %s2601_s19  }
  0xbd   : > { %1991 = vmatpush3.bf16.msra.mxu1 %v1990_v9  ;;  %1986 = vmatprep.subr.bf16.mxu0 %v2477_v4  ;;  %v823_v32 = vld [vmem:[#allocation11 + $0x28] sm:$0xff]  ;;  %v824_v34 = vld [vmem:[#allocation11 + $0x30] sm:$0xff]  ;;  %v825_v35 = vld [vmem:[#allocation11 + $0x38] sm:$0xff]  ;;  %s2979_s29 = sshll.u32 %s2601_s19, 4  ;;  %s2989_s26 = scalar_lea.sflag [#allocation16], %s1553_s17 }
  0xbe   : > { %1992 = vmatprep.subr.bf16.mxu1 %v2477_v4  ;;  %v1996_v33 = vpack.c.bf16 %v823_v32, %v822_v31  ;;  %v1999_v36 = vpack.c.bf16 %v825_v35, %v824_v34  ;;  %v817_v38 = vld [vmem:[#allocation11] sm:$0xff]  ;;  %v818_v39 = vld [vmem:[#allocation11 + $0x8] sm:$0xff]  ;;  %v819_v43 = vld [vmem:[#allocation11 + $0x10] sm:$0xff]  ;;  %s2985_s21 = scalar_lea.hbm %s3104_s15, %s2979_s29  ;;  %p3152_p6 = scmp.ne.s32.totalorder %s3134_s25, 0 }
  0xbf   : > { %s569_s24 = scalar_lea.vmem %s3090_s1, %s568_s14  ;;  %v2002_v41 = vpack.c.bf16 %v818_v39, %v817_v38  ;;  %v820_v44 = vld [vmem:[#allocation11 + $0x18] sm:$0xff]  ;;  %v974_v56 = vld [vmem:[%s3097_s8 + $0x10] sm:$0xff]  ;;  %v975_v57 = vld [vmem:[%s3097_s8 + $0x18] sm:$0xff]  ;;  %s3151_s14 = sld [smem:[#allocation32_spill]] }
  0xc0   : > { %1988 = vmatpush3.bf16.msra.mxu0 %v1987_v13  ;;  %v570_v16 = vld [vmem:[%s569_s24] sm:$0x1]  ;;  %v2005_v45 = vpack.c.bf16 %v820_v44, %v819_v43  ;;  %v973_v47 = vld [vmem:[%s3097_s8 + $0x8] sm:$0xff]  ;;  %v2011_v58 = vpack.c.bf16 %v975_v57, %v974_v56  ;;  %v1769_v59 = vld [vmem:[%s3097_s8 + $0x30] sm:$0xff]  ;;  %s1583_s24 = sshll.u32 %s553_s30, 4  ;;  %s2480_s3 = smov [#allocation15]   ;;  %s1584_s24 = int_to_ptr.vmem [resolvable:$true] %s1583_s24 }
  0xc1   : > { %1994 = vmatpush3.bf16.msra.mxu1 %v1993_v14  ;;  %1879 = vmatprep.subr.mxu0 %v2479_v12  ;;  %v972_v46 = vld [vmem:[%s3097_s8] sm:$0xff]  ;;  %v1768_v54 = vld [vmem:[%s3097_s8 + $0x28] sm:$0xff]  ;;  %v1770_v60 = vld [vmem:[%s3097_s8 + $0x38] sm:$0xff]  ;;  %s2331_s18 = scalar_lea.vmem %s1584_s24, 16  ;;  %s2335_s28 = sshll.u32 %s2480_s3, 4  ;;  %s2336_s28 = int_to_ptr.vmem [resolvable:$false] %s2335_s28 }
  0xc2   : > { %1995 = vmatprep.subr.bf16.mxu1 %v2477_v4  ;;  %v2008_v48 = vpack.c.bf16 %v973_v47, %v972_v46  ;;  %v1767_v53 = vld [vmem:[%s3097_s8 + $0x20] sm:$0xff]  ;;  %v2017_v61 = vpack.c.bf16 %v1770_v60, %v1769_v59  ;;  %v1774_v3 = vld [vmem:[%s3097_s8 + $0x48] sm:$0xff]  ;;  %v1775_v10 = vld [vmem:[%s3097_s8 + $0x50] sm:$0xff]  ;;  %p2332_p0 = scmp.ne.s32.totalorder %s1584_s24, %s2331_s18  ;;  %s2337_s19 = scalar_lea.vmem %s2336_s28, 32 }
  0xc3   : > { %1866 = vmatmul.mubr.msk.f32.vlgmr.msra.gmra.mrb[0].mxu0 %vm580_vm2, %v2811_v15  ;;  %v2014_v55 = vpack.c.bf16 %v1768_v54, %v1767_v53  ;;  %v969_v63 = vld [vmem:[%s3096_s7] sm:$0x1]  ;;  %v1781_v6 = vld [vmem:[%s3099_s10 + $0x28] sm:$0xff]  ;;  %v1776_v13 = vld [vmem:[%s3097_s8 + $0x58] sm:$0xff]  ;;  %p2338_p11 = scmp.lt.s32.totalorder %s1584_s24, %s2336_s28  ;;  %p2339_p1 = scmp.lt.s32.totalorder %s2337_s19, %s2331_s18 }
  0xc4   : > { %1877 = vmatmul.mubr.msk.f32.vlgmr.msra.gmra.mrb[0].mxu1 %vm580_vm2, %v570_v16  ;;  %1881 = vmatprep.mubr.msk.f32.mxu0 %vm2478_vm1, %v2479_v12  ;;  %v1773_v0 = vld [vmem:[%s3097_s8 + $0x40] sm:$0xff]  ;;  %v1782_v14 = vld [vmem:[%s3099_s10 + $0x30] sm:$0xff]  ;;  %p2333_p7 = pnand %p2332_p0, %p3152_p6 }
  0xc5   : > { %1892 = vmatprep.mubr.msk.f32.mxu1 %vm2478_vm1, %v2479_v12  ;;  %1880 = vmatpush3.msra.mxu0 %v742_v30  ;;  %v1780_v5 = vld [vmem:[%s3099_s10 + $0x20] sm:$0xff]  ;;  %v2020_v8 = vpack.c.bf16 %v1774_v3, %v1773_v0  ;;  %v1457_v31 = vld [vmem:[#allocation13] sm:$0xff]  ;;  %v1458_v32 = vld [vmem:[#allocation13 + $0x8] sm:$0xff]  ;;  %p2340_p3 = por %p2339_p1, %p2338_p11 }
  0xc6   : > { %2001 = vmatprep.subr.bf16.mxu0 %v2477_v4  ;;  %1997 = vmatpush3.bf16.msra.mxu1 %v1996_v33  ;;  %v2032_v9 = vpack.c.bf16 %v1781_v6, %v1780_v5  ;;  %v1459_v33 = vld [vmem:[#allocation13 + $0x10] sm:$0xff]  ;;  %v2044_v34 = vpack.c.bf16 %v1458_v32, %v1457_v31  ;;  %v1460_v35 = vld [vmem:[#allocation13 + $0x18] sm:$0xff]  ;;  %p2334_p10 = pneg %p2333_p7 }
  0xc7   : > { %1998 = vmatprep.subr.bf16.mxu1 %v2477_v4  ;;  %v1790_v56 = vld [vmem:[%s3100_s11 + $0x2] sm:$0x1] }
  0xc8   : > { %v1777_v59 = vld [vmem:[%s3151_s14 + $0x2] sm:$0x1]  ;;  %p2341_p4 = pnand %p2340_p3, %p2334_p10 }
  0xca   : > { %2000 = vmatpush3.bf16.msra.mxu1 %v1999_v36  ;;  %v2047_v36 = vpack.c.bf16 %v1460_v35, %v1459_v33 }
  0xcb   : > { %2007 = vmatprep.subr.bf16.mxu1 %v2477_v4 }
 0x196   : > { %v650_v17 = vpop.f32.mrb[0].mxu0 }
 0x197   : > { %v723_v18 = vpop.f32.mrb[0].mxu1  ;;  %v1867_v19 = vpop.f32.mrb[1].mxu0 }
 0x198   : > { %v724_v21 = vadd.f32 %v723_v18, %v650_v17  ;;  %v1878_v22 = vpop.f32.mrb[1].mxu1  ;;  %v2023_v17 = vpack.c.bf16 %v1776_v13, %v1775_v10  ;;  %v1204_v19 = vld [vmem:[%s3099_s10] sm:$0xff] }
 0x199   : > { %v1787_v22 = vld [vmem:[%s3099_s10 + $0x48] sm:$0xff] }
 0x19a   : > { %v728_v23 = vadd.f32 %v727_v20, %v724_v21  ;;  %v1205_v20 = vld [vmem:[%s3099_s10 + $0x8] sm:$0xff]  ;;  %v1786_v21 = vld [vmem:[%s3099_s10 + $0x40] sm:$0xff] }
 0x19c   : > { %v730_v24 = vsel %vm729_vm3, %v728_v23, -inf }
 0x19d   : > { %731 = vmax.xlane.f32.xlu0 %v730_v24  ;;  %v1206_v24 = vld [vmem:[%s3099_s10 + $0x10] sm:$0xff] }
 0x22a   : > { %v732_v25 = vpop.xlane.xlu0 %731 }
 0x22b   : > { %v733_v26 = vsub.f32 %v728_v23, %v732_v25  ;;  %v2026_v23 = vpack.c.bf16 %v1205_v20, %v1204_v19  ;;  %v1207_v25 = vld [vmem:[%s3099_s10 + $0x18] sm:$0xff] }
 0x22d   : > { %v734_v27 = vmul.f32 1.442695, %v733_v26  ;;  %v2038_v26 = vpack.c.bf16 %v1787_v22, %v1786_v21 }
 0x22f   : > { %2163 = vpow2.f32 %v734_v27  ;;  %v1788_v27 = vld [vmem:[%s3099_s10 + $0x50] sm:$0xff] }
 0x239   : > { %v2164_v28 = vpop.eup %2163 }
 0x23a   : > { %v736_v29 = vsel %vm729_vm3, %v2164_v28, 0.0 }
 0x23b   : > { %737 = vadd.xlane.f32.xlu0 %v736_v29  ;;  %v2029_v29 = vpack.c.bf16 %v1207_v25, %v1206_v24 }
 0x2c8   : > { %v738_v37 = vpop.xlane.xlu0 %737 }
 0x2c9   : > { %2165 = vrcp.f32 %v738_v37 }
 0x2d3   : > { %v2166_v40 = vpop.eup %2165 }
 0x2d4   : > { %v740_v42 = vmul.f32 %v2166_v40, %v2164_v28  ;;  %v1789_v28 = vld [vmem:[%s3099_s10 + $0x58] sm:$0xff] }
 0x2d5   : > { %v2041_v30 = vpack.c.bf16 %v1789_v28, %v1788_v27 }
 0x2d6   : > { %741 = vst.msk [vmem:[%s559_s20] sm:$0x1] %vm729_vm3, %v740_v42  ;;  %1882 = vmatmul.mubr.msk.f32.vlgmr.msra.gmra.mrb[2].mxu0 %vm743_vm4, %v740_v42  ;;  %v1771_v42 = vld [vmem:[%s3151_s14 + $0x1] sm:$0x1] }
 0x2d7   : > { %2003 = vmatpush3.bf16.msra.mxu0 %v2002_v41  ;;  %1903 = vmatprep.mubr.msk.f32.mxu0 %vm2478_vm1, %v2479_v12  ;;  %v976_v41 = vld [vmem:[%s3151_s14] sm:$0x1] }
 0x2d8   : > { %2004 = vmatprep.subr.bf16.mxu0 %v2477_v4 }
 0x2db   : > { %2006 = vmatpush3.bf16.msra.mxu0 %v2005_v45 }
 0x2dc   : > { %2013 = vmatprep.subr.bf16.mxu0 %v2477_v4 }
 0x2de   : > { %1904 = vmatmul.mubr.msk.f32.vlgmr.msra.gmra.mrb[4].mxu0 %vm580_vm2, %v570_v16  ;;  %v1783_v16 = vld [vmem:[%s3099_s10 + $0x38] sm:$0xff] }
 0x2df   : > { %1925 = vmatprep.mubr.msk.f32.mxu0 %vm2478_vm1, %v2479_v12  ;;  %2015 = vmatpush3.bf16.msra.mxu0 %v2014_v55  ;;  %v2035_v18 = vpack.c.bf16 %v1783_v16, %v1782_v14 }
 0x2e0   : > { %2016 = vmatprep.subr.bf16.mxu0 %v2477_v4 }
 0x2e3   : > { %2018 = vmatpush3.bf16.msra.mxu0 %v2017_v61 }
 0x2e4   : > { %2031 = vmatprep.subr.bf16.mxu0 %v2477_v4 }
 0x3a9   : > { %v813_v49 = vpop.f32.mrb[2].mxu0 }
 0x3aa   : > { %v1883_v50 = vpop.f32.mrb[3].mxu0  ;;  %1893 = vmatmul.mubr.msk.f32.vlgmr.msra.gmra.mrb[2].mxu1 %vm580_vm2, %v813_v49 }
 0x3ab   : > { %2009 = vmatpush3.bf16.msra.mxu1 %v2008_v48  ;;  %1914 = vmatprep.mubr.msk.f32.mxu1 %vm2478_vm1, %v2479_v12 }
 0x3ac   : > { %2010 = vmatprep.subr.bf16.mxu1 %v2477_v4 }
 0x3af   : > { %2012 = vmatpush3.bf16.msra.mxu1 %v2011_v58 }
 0x3b0   : > { %2019 = vmatprep.subr.bf16.mxu1 %v2477_v4 }
 0x3b1   : > { %v965_v51 = vpop.f32.mrb[4].mxu0 }
 0x3b2   : > { %v1905_v52 = vpop.f32.mrb[5].mxu0 }
 0x47d   : > { %v895_v62 = vpop.f32.mrb[2].mxu1 }
 0x47e   : > { %v966_v1 = vadd.f32 %v965_v51, %v895_v62  ;;  %v1894_v2 = vpop.f32.mrb[3].mxu1 }
 0x480   : > { %v970_v7 = vadd.f32 %v969_v63, %v966_v1 }
 0x482   : > { %v971_v11 = vmax.f32 %v970_v7, 0.0  ;;  %v1461_v7 = vld [vmem:[%s3102_s13] sm:$0x1] }
 0x484   : > { %1915 = vmatmul.mubr.msk.f32.vlgmr.msra.gmra.mrb[4].mxu1 %vm580_vm2, %v971_v11  ;;  %1926 = vmatmul.mubr.msk.f32.vlgmr.msra.gmra.mrb[6].mxu0 %vm580_vm2, %v971_v11 }
 0x485   : > { %2021 = vmatpush3.bf16.msra.mxu1 %v2020_v8  ;;  %2033 = vmatpush3.bf16.msra.mxu0 %v2032_v9 }
 0x486   : > { %2022 = vmatprep.subr.bf16.mxu1 %v2477_v4  ;;  %2034 = vmatprep.subr.bf16.mxu0 %v2477_v4 }
 0x487   : > { %1936 = vmatprep.mubr.msk.f32.mxu1 %vm2478_vm1, %v2479_v12  ;;  %1958 = vmatprep.mubr.msk.f32.mxu0 %vm2478_vm1, %v2479_v12 }
 0x489   : > { %2024 = vmatpush3.bf16.msra.mxu1 %v2023_v17  ;;  %2036 = vmatpush3.bf16.msra.mxu0 %v2035_v18 }
 0x48a   : > { %2025 = vmatprep.subr.bf16.mxu1 %v2477_v4  ;;  %2037 = vmatprep.subr.bf16.mxu0 %v2477_v4 }
 0x48c   : > { %1937 = vmatmul.mubr.msk.f32.vlgmr.msra.gmra.mrb[6].mxu1 %vm580_vm2, %v971_v11  ;;  %1959 = vmatmul.mubr.msk.f32.vlgmr.msra.gmra.mrb[6].mxu0 %vm580_vm2, %v2811_v15 }
 0x48d   : > { %2027 = vmatpush3.bf16.msra.mxu1 %v2026_v23  ;;  %1947 = vmatprep.mubr.msk.f32.mxu1 %vm2478_vm1, %v2479_v12 }
 0x48e   : > { %2028 = vmatprep.subr.bf16.mxu1 %v2477_v4  ;;  %2039 = vmatpush3.bf16.msra.mxu0 %v2038_v26 }
 0x48f   : > { %2040 = vmatprep.subr.bf16.mxu0 %v2477_v4  ;;  %1969 = vmatprep.mubr.msk.f32.mxu0 %vm2478_vm1, %v2479_v12 }
 0x491   : > { %2030 = vmatpush3.bf16.msra.mxu1 %v2029_v29 }
 0x492   : > { %2042 = vmatpush3.bf16.msra.mxu0 %v2041_v30  ;;  %2043 = vmatprep.subr.bf16.mxu1 %v2477_v4 }
 0x494   : > { %1948 = vmatmul.mubr.msk.f32.vlgmr.msra.gmra.mrb[4].mxu1 %vm580_vm2, %v2811_v15 }
 0x495   : > { %1970 = vmatmul.mubr.msk.f32.vlgmr.msra.gmra.mrb[8].mxu0 %vm580_vm2, %v2811_v15  ;;  %1980 = vmatprep.mubr.msk.f32.mxu1 %vm2478_vm1, %v2479_v12  ;;  %v1208_v12 = vld [vmem:[%s3100_s11] sm:$0x1] }
 0x496   : > { %2045 = vmatpush3.bf16.msra.mxu1 %v2044_v34  ;;  %v2049_v43 = vadd.f32 %v1208_v12, %v976_v41 }
 0x497   : > { %2046 = vmatprep.subr.bf16.mxu1 %v2477_v4  ;;  %v1784_v4 = vld [vmem:[%s3100_s11 + $0x1] sm:$0x1] }
 0x498   : > { %v2051_v44 = vadd.f32 %v1784_v4, %v1771_v42 }
 0x49a   : > { %2048 = vmatpush3.bf16.msra.mxu1 %v2047_v36 }
 0x55f   : > { %v1200_v37 = vpop.f32.mrb[6].mxu1  ;;  %v1352_v38 = vpop.f32.mrb[6].mxu0 }
 0x560   : > { %v1938_v39 = vpop.f32.mrb[7].mxu1  ;;  %v1960_v40 = vpop.f32.mrb[7].mxu0  ;;  %v2052_v51 = vadd.f32 %v2051_v44, %v1352_v38  ;;  %v1201_v61 = vadd.f32 %v1777_v59, %v1200_v37 }
 0x562   : > { %v1793_v52 = vmul.f32 -1.442695, %v2052_v51 }
 0x567   : > { %v1275_v45 = vpop.f32.mrb[4].mxu1 }
 0x568   : > { %v2050_v46 = vadd.f32 %v2049_v43, %v1275_v45  ;;  %v1949_v47 = vpop.f32.mrb[5].mxu1  ;;  %v1429_v48 = vpop.f32.mrb[8].mxu0 }
 0x569   : > { %v1971_v49 = vpop.f32.mrb[9].mxu0  ;;  %v1430_v58 = vadd.f32 %v1790_v56, %v1429_v48 }
 0x56a   : > { %v1792_v50 = vmul.f32 -1.442695, %v2050_v46 }
 0x56c   : > { %2167 = vpow2.f32 %v1792_v50 }
 0x56d   : > { %2169 = vpow2.f32 %v1793_v52 }
 0x576   : > { %v2168_v53 = vpop.eup %2167 }
 0x577   : > { %v1437_v54 = vadd.f32 1.0, %v2168_v53  ;;  %v2170_v55 = vpop.eup %2169 }
 0x578   : > { %v1444_v57 = vadd.f32 1.0, %v2170_v55 }
 0x579   : > { %2171 = vrcp.f32 %v1437_v54 }
 0x57a   : > { %2173 = vrcp.f32 %v1444_v57 }
 0x583   : > { %v2172_v60 = vpop.eup %2171 }
 0x584   : > { %v1447_v62 = vmul.f32 %v2172_v60, %v1430_v58  ;;  %v2174_v0 = vpop.eup %2173 }
 0x585   : > { %v1450_v1 = vsub.f32 1.0, %v2174_v0  ;;  %v1452_v5 = vmul.f32 %v2174_v0, %v2811_v15 }
 0x586   : > { %v1448_v63 = vadd.f32 %v1447_v62, %v1201_v61 }
 0x588   : > { %2175 = vtanh.f32 %v1448_v63 }
 0x592   : > { %v2176_v2 = vpop.eup %2175 }
 0x593   : > { %v1451_v3 = vmul.f32 %v2176_v2, %v1450_v1 }
 0x595   : > { %v1453_v6 = vadd.f32 %v1452_v5, %v1451_v3 }
 0x597   : > { %1981 = vmatmul.mubr.msk.f32.vlgmr.msra.gmra.mrb[8].mxu1 %vm580_vm2, %v1453_v6  ;;  %1455 = vst.msk [vmem:[%s553_s30] sm:$0x1] %vm1454_vm5, %v1453_v6  ;;  %1456 = vst.msk [vmem:[#allocation2] sm:$0x1] %vm1454_vm5, %v1453_v6 }
 0x66a   : > { %v1531_v8 = vpop.f32.mrb[8].mxu1 }
 0x66b   : > { %v1532_v9 = vadd.f32 %v1531_v8, %v1461_v7  ;;  %v1982_v10 = vpop.f32.mrb[9].mxu1 }
 0x66d   : > { %v1536_v11 = vsel %vm1535_vm6, %v1532_v9, -inf }
 0x66e   : > { %1537 = vmax.xlane.f32.xlu1 %v1536_v11 }
 0x6fb   : > { %v1538_v15 = vpop.xlane.xlu1 %1537 }
 0x6fc   : > { %v2974_v13 = vsub.f32 %v1532_v9, %v1538_v15 }
 0x6fe   : > { %v1540_v14 = vmul.f32 1.442695, %v2974_v13 }
 0x700   : > { %2177 = vpow2.f32 %v1540_v14 }
 0x70a   : > { %v2178_v16 = vpop.eup %2177 }
 0x70b   : > { %v1542_v17 = vsel %vm1535_vm6, %v2178_v16, 0.0 }
 0x70c   : > { %1543 = vadd.xlane.f32.xlu1 %v1542_v17 }
 0x70d   : > { %2344 = shalt.err (!%p2341_p4)
}
 0x70e   : > { %s2345_s30 = scalar_lea.hbm %s2985_s21, 16  ;;  %s2349_s0 = scalar_lea.hbm %s3104_s15, 64 }
 0x70f   : > { %p2346_p5 = scmp.ne.s32.totalorder %s2985_s21, %s2345_s30  ;;  %p2350_p12 = scmp.lt.u32.totalorder %s2985_s21, %s3104_s15 }
 0x710   : > { %p2351_p2 = scmp.lt.u32.totalorder %s2349_s0, %s2345_s30  ;;  %p2353_p0 = scmp.lt.u32.totalorder %s2345_s30, %s2985_s21 }
 0x711   : > { %p2347_p9 = pnand %p2346_p5, %p3152_p6 }
 0x712   : > { %p2352_p13 = por %p2351_p2, %p2350_p12 }
 0x713   : > { %p2348_p8 = pneg %p2347_p9 }
 0x714   : > { %p2354_p7 = por %p2353_p0, %p2352_p13 }
 0x716   : > { %p2355_p10 = pnand %p2354_p7, %p2348_p8 }
 0x718   : > { %2358 = shalt.err (!%p2355_p10)
}
 0x719   : > { %2078 = dma.vmem_to_hbm [thread:$0]  (%p3152_p6), %s1584_s24, 16, %s2985_s21, %s2989_s26  }
 0x71a   : > { %s3153_s19 = sld [smem:[#allocation34_spill]]  ;;  %s1596_s17 = sshll.u32 %s559_s20, 4  ;;  %s1597_s17 = int_to_ptr.vmem [resolvable:$true] %s1596_s17 }
 0x71b   : > { %s2359_s30 = scalar_lea.vmem %s1597_s17, 16  ;;  %s2481_s0 = smov [#allocation17]  }
 0x71c   : > { %p2360_p11 = scmp.ne.s32.totalorder %s1597_s17, %s2359_s30  ;;  %s2363_s22 = sshll.u32 %s2481_s0, 4  ;;  %s2364_s22 = int_to_ptr.vmem [resolvable:$false] %s2363_s22 }
 0x71d   : > { %s2365_s3 = scalar_lea.vmem %s2364_s22, 32  ;;  %p2366_p4 = scmp.lt.s32.totalorder %s1597_s17, %s2364_s22 }
 0x71e   : > { %p2361_p1 = pnand %p2360_p11, %p3152_p6  ;;  %p2367_p5 = scmp.lt.s32.totalorder %s2365_s3, %s2359_s30 }
 0x720   : > { %s3013_s16 = scalar_lea.hbm %s3153_s19, %s2979_s29  ;;  %p2362_p3 = pneg %p2361_p1 }
 0x721   : > { %p2368_p9 = por %p2367_p5, %p2366_p4 }
 0x723   : > { %p2369_p8 = pnand %p2368_p9, %p2362_p3 }
 0x725   : > { %2372 = shalt.err (!%p2369_p8)
}
 0x726   : > { %s2373_s20 = scalar_lea.hbm %s3013_s16, 16  ;;  %s2377_s18 = scalar_lea.hbm %s3153_s19, 64 }
 0x727   : > { %p2374_p12 = scmp.ne.s32.totalorder %s3013_s16, %s2373_s20  ;;  %p2378_p0 = scmp.lt.u32.totalorder %s3013_s16, %s3153_s19 }
 0x728   : > { %p2379_p7 = scmp.lt.u32.totalorder %s2377_s18, %s2373_s20  ;;  %p2381_p11 = scmp.lt.u32.totalorder %s2373_s20, %s3013_s16 }
 0x729   : > { %p2375_p2 = pnand %p2374_p12, %p3152_p6 }
 0x72a   : > { %p2380_p10 = por %p2379_p7, %p2378_p0 }
 0x72b   : > { %p2376_p13 = pneg %p2375_p2 }
 0x72c   : > { %p2382_p1 = por %p2381_p11, %p2380_p10 }
 0x72e   : > { %p2383_p3 = pnand %p2382_p1, %p2376_p13 }
 0x730   : > { %2386 = shalt.err (!%p2383_p3)
}
 0x731   : > { %2079 = dma.vmem_to_hbm [thread:$0]  (%p3152_p6), %s1597_s17, 16, %s3013_s16, %s2989_s26  }
 0x732   : > { %s1570_s30 = sshll.u32 %s547_s23, 4  ;;  %s3154_s20 = sld [smem:[#allocation33_spill]]  ;;  %s3044_s30 = int_to_ptr.vmem [resolvable:$true] %s1570_s30 }
 0x733   : > { %s1550_s26 = scalar_lea.sflag [#allocation7], %s2771_s27  ;;  %s2387_s16 = scalar_lea.vmem %s3044_s30, 16 }
 0x734   : > { %p2388_p4 = scmp.ne.s32.totalorder %s3044_s30, %s2387_s16  ;;  %s2482_s17 = smov [#allocation14]  }
 0x735   : > { %s2391_s24 = sshll.u32 %s2482_s17, 4  ;;  %s2392_s24 = int_to_ptr.vmem [resolvable:$false] %s2391_s24 }
 0x736   : > { %p2389_p5 = pnand %p2388_p4, %p3152_p6  ;;  %s2393_s18 = scalar_lea.vmem %s2392_s24, 32 }
 0x737   : > { %p2394_p8 = scmp.lt.s32.totalorder %s3044_s30, %s2392_s24  ;;  %p2395_p12 = scmp.lt.s32.totalorder %s2393_s18, %s2387_s16 }
 0x738   : > { %s3042_s21 = scalar_lea.hbm %s3154_s20, %s2979_s29  ;;  %p2390_p9 = pneg %p2389_p5 }
 0x739   : > { %p2396_p2 = por %p2395_p12, %p2394_p8 }
 0x73b   : > { %p2397_p13 = pnand %p2396_p2, %p2390_p9 }
 0x799   : > { %v1544_v18 = vpop.xlane.xlu1 %1543 }
 0x79a   : > { %2179 = vlog2.f32 %v1544_v18 }
 0x7a4   : > { %v2180_v19 = vpop.eup %2179 }
 0x7a5   : > { %v1546_v20 = vmul.f32 0.6931472, %v2180_v19 }
 0x7a7   : > { %v1547_v21 = vsub.f32 %v2974_v13, %v1546_v20 }
 0x7a9   : > { %1548 = vst [vmem:[%s547_s23] sm:$0x1] %v1547_v21 }
 0x7aa   : > { %2400 = shalt.err (!%p2397_p13)
}
 0x7ab   : > { %s2401_s27 = scalar_lea.hbm %s3042_s21, 16  ;;  %s2405_s28 = scalar_lea.hbm %s3154_s20, 64 }
 0x7ac   : > { %p2402_p0 = scmp.ne.s32.totalorder %s3042_s21, %s2401_s27  ;;  %p2406_p11 = scmp.lt.u32.totalorder %s3042_s21, %s3154_s20 }
 0x7ad   : > { %p2407_p1 = scmp.lt.u32.totalorder %s2405_s28, %s2401_s27  ;;  %p2409_p4 = scmp.lt.u32.totalorder %s2401_s27, %s3042_s21 }
 0x7ae   : > { %p2403_p7 = pnand %p2402_p0, %p3152_p6 }
 0x7af   : > { %p2408_p3 = por %p2407_p1, %p2406_p11 }
 0x7b0   : > { %p2404_p10 = pneg %p2403_p7 }
 0x7b1   : > { %p2410_p5 = por %p2409_p4, %p2408_p3 }
 0x7b3   : > { %p2411_p9 = pnand %p2410_p5, %p2404_p10 }
 0x7b5   : > { %2414 = shalt.err (!%p2411_p9)
}
 0x7b6   : > { %2077 = dma.vmem_to_hbm [thread:$0]  (%p3152_p6), %s3044_s30, 16, %s3042_s21, %s1550_s26  }
 0x7b7 PF: > { %s3155_s3 = sld [smem:[#allocation26_spill]]  ;;  %s3156_s16 = sld [smem:[#allocation24_spill]] }
 0x7b8   : > { %s3157_s17 = sld [smem:[#allocation29_spill]] }
 0x7bd   : > { %p2119_p8 = scmp.ge.s32.totalorder %s3155_s3, 2  ;;  %s1608_s24 = sand.u32 1, %s3156_s16  }
 0x7be   : > { %p3158_p12 = scmp.ne.s32.totalorder %s3157_s17, 0  ;;  %s1609_s18 = scalar_lea.sflag [#allocation7], %s1608_s24 }
 0x7c0   : > { %p2100_p2 = pnand %p2119_p8, %p3158_p12 }
 0x7c2   : > { %2446 = dma.done.wait (!%p2100_p2), %s1609_s18, 16  }
 0x7c3   : > { %2448 = vsyncadd (!%p2100_p2), %s1609_s18, 4294967280  ;;  %s3159_s27 = sadd.s32 4294967294, %s3155_s3  }
 0x7c4   : > { %s1616_s23 = sand.u32 1, %s3159_s27  }
 0x7c5   : > { %s1617_s29 = scalar_lea.sflag [#allocation16], %s1616_s23 }
 0x7c6   : > { %2450 = dma.done.wait (!%p2100_p2), %s1617_s29, 32  }
 0x7c7   : > { %2452 = vsyncadd (!%p2100_p2), %s1617_s29, 4294967264  ;;  %s3160_s18 = sld [smem:[#allocation27_spill]]  ;;  %s3161_s25 = sld [smem:[#allocation25_spill]] }
 0x7c8   : > { %s3162_s17 = sld [smem:[#allocation28_spill]]  ;;  %s3163_s0 = smov %s2459_s9 }
 0x7cd   : > { %p37_p6 = scmp.ge.s32.totalorder %s3160_s18, 6   ;;  %s3164_s9 = smov %s3161_s25 }
 0x7cf   :  { %39 = sbr.rel (!%p37_p6) target bundleno = 27 (0x1b), region = 172 }
 0x7d6   :  { %1629 = vsyncpa [#allocation6], 1 }
 0x7d7   :  { %1631 = vsyncpa [#allocation6 + $0x1], 1 }
 0x7d8   :  { %1632 = vsyncpa [#allocation9], 1 }
 0x7d9   :  { %1633 = vsyncpa [#allocation12], 1 }
 0x7da   :  { %1634 = vsyncpa [#allocation7], 1 }
 0x7db   :  { %1636 = vsyncpa [#allocation7 + $0x1], 1 }
 0x7dc   :  { %1637 = vsyncpa [#allocation16], 1 }
 0x7dd   :  { %1639 = vsyncpa [#allocation16 + $0x1], 1 }

</bundles_post_ra>
